<compile_context>
chip_gen: v6e
topology: v6e:2x2x1
jax: 0.10.0
libtpu: 0.0.40
codegen_flags: <defaults>
</compile_context>

<pallas_src>
import math

import jax
import jax.numpy as jnp
from jax.experimental import pallas as pl
from jax.experimental.pallas import tpu as pltpu

NEG_SLOPE = 0.01   # nn.LeakyReLU(0.01)
EPS = 1e-5         # RMSNorm eps


# ----------------------------------------------------------------------------
# Elementwise helpers shared by the kernel and the references (identical formulas).
# ----------------------------------------------------------------------------
def _leaky(x):
    return jnp.where(x >= 0, x, NEG_SLOPE * x)


def _sigmoid(x):
    return 1.0 / (1.0 + jnp.exp(-x))


def _silu(x):
    return x * _sigmoid(x)


def _softplus(x):
    # log(1 + exp(x)), numerically stable; same expression in kernel & references.
    return jnp.maximum(x, 0.0) + jnp.log(1.0 + jnp.exp(-jnp.abs(x)))


# ----------------------------------------------------------------------------
# Lane-dense forward math (activations are (features, rows)).
# Used verbatim by the Pallas kernel and the "same math" JAX reference.
# ----------------------------------------------------------------------------
_WEIGHT_ORDER = ('lin1_w', 'lin1_b', 'out1_w', 'out1_b', 'norm_w',
                 'a_w', 'a_b', 'convlin_w', 'convlin_b',
                 'f_w', 'f_b', 'outp_w', 'outp_b')


def _forward_math(x_t, lin1_w, lin1_b, out1_w, out1_b, norm_w,
                  a_w, a_b, convlin_w, convlin_b, f_w, f_b, outp_w, outp_b):
    median = convlin_w.shape[-1]
    state = (f_w.shape[-2] - median) // 2

    def mm(w_bf16, act):
        # bf16 MXU matmul with f32 accumulation (weights already bf16).
        return jnp.dot(w_bf16, act.astype(jnp.bfloat16),
                       preferred_element_type=jnp.float32)

    def mamba_block(h, blk):
        # RMSNorm over the feature (sublane) axis.
        ms = jnp.mean(h * h, axis=0, keepdims=True)
        xn = h * jax.lax.rsqrt(ms + EPS) * norm_w[blk]
        # Fused [conv-folded inp_proj | D] matmul over x_norm.
        a = mm(a_w[blk], xn) + a_b[blk]
        xc = a[:median]            # == conv(inp_proj(xn)) pre-activation
        d_branch = a[median:]      # == D(xn)
        xco = mm(convlin_w[blk], _silu(xc)) + convlin_b[blk]
        # Fused [fc1 | fc2 | fc3] matmul over x_conv_out.
        f = mm(f_w[blk], xco) + f_b[blk]
        delta = _softplus(f[:median])
        bc = jnp.sum(f[median:median + state] * f[median + state:],
                     axis=0, keepdims=True)
        # S6 with h0 == 0 and seq_len == 1:  y = x * delta * sum_n(B*C).
        # TODO(synk): S6.fc4 and the A / dA = exp(delta*A) path multiply a zero state
        # and are dead code in this forward; they are folded out of the kernel.
        x_comb = _silu(xco * delta * bc) * _silu(d_branch)
        return mm(outp_w[blk], x_comb) + outp_b[blk]

    x1 = _leaky(mm(lin1_w, x_t) + lin1_b)
    x2 = mamba_block(x1, 0) + x1
    x3 = mamba_block(x2, 1) + x2
    h = mamba_block(x3, 2) + x3
    return _leaky(mm(out1_w, h) + out1_b)


def _pure_mamba_kernel(x_ref, lin1_w, lin1_b, out1_w, out1_b, norm_w,
                       a_w, a_b, convlin_w, convlin_b, f_w, f_b,
                       outp_w, outp_b, o_ref):
    o_ref[...] = _forward_math(
        x_ref[...], lin1_w[...], lin1_b[...], out1_w[...], out1_b[...],
        norm_w[...], a_w[...], a_b[...], convlin_w[...], convlin_b[...],
        f_w[...], f_b[...], outp_w[...], outp_b[...])


# ----------------------------------------------------------------------------
# Host-side weight prep: fold the conv, fuse shared-input matmuls, transpose to
# (out, in) for the lane-dense kernel, pre-cast MXU operands to bf16.
# ----------------------------------------------------------------------------
def _prep_kernel_params(params):
    median = params['inp_w'].shape[-1]
    f32, bf16 = jnp.float32, jnp.bfloat16

    def t(w):    # (..., in, out) -> (..., out, in), bf16 MXU operand
        return jnp.swapaxes(w, -1, -2).astype(bf16)

    def col(b):  # (..., 1, out) -> (..., out, 1), f32
        return jnp.swapaxes(b, -1, -2).astype(f32)

    # Conv1d(1, 1, 3, padding=1) along the feature axis (seq_len == 1) as a tridiagonal
    # tap matrix T, folded into inp_proj:  conv3(x @ W + b) == x @ (W @ T) + (b @ T + cb)
    cw, cb = params['conv_w'], params['conv_b']                        # (3, 3), (3,)
    T = (cw[:, 0][:, None, None] * jnp.eye(median, k=1, dtype=f32)
         + cw[:, 1][:, None, None] * jnp.eye(median, dtype=f32)
         + cw[:, 2][:, None, None] * jnp.eye(median, k=-1, dtype=f32))  # (3, m, m)
    inp_w_eff = jnp.einsum('bij,bjk->bik', params['inp_w'], T)
    inp_b_eff = jnp.einsum('bij,bjk->bik', params['inp_b'], T) + cb[:, None, None]

    return dict(
        lin1_w=t(params['lin1_w']), lin1_b=col(params['lin1_b']),
        out1_w=t(params['out1_w']), out1_b=col(params['out1_b']),
        norm_w=jnp.swapaxes(params['norm_w'], -1, -2).astype(f32),      # (3, m, 1)
        a_w=t(jnp.concatenate([inp_w_eff, params['d_w']], axis=-1)),    # (3, 2m, m)
        a_b=col(jnp.concatenate([inp_b_eff, params['d_b']], axis=-1)),
        convlin_w=t(params['convlin_w']), convlin_b=col(params['convlin_b']),
        f_w=t(jnp.concatenate([params['fc1_w'], params['fc2_w'],
                               params['fc3_w']], axis=-1)),             # (3, m+2s, m)
        f_b=col(jnp.concatenate([params['fc1_b'], params['fc2_b'],
                                 params['fc3_b']], axis=-1)),
        outp_w=t(params['outp_w']), outp_b=col(params['outp_b']))


def pure_mamba_forward(x, params, *, tile_m=1024):
    """pureMamba.forward — returns a 5-tuple of the same (N, output_size) array."""
    d_model = params['lin1_w'].shape[0]
    median = params['inp_w'].shape[-1]
    state = params['fc2_w'].shape[-1]
    out_dim = params['out1_w'].shape[1]

    # The module reshapes to (-1, 1, d_model): every MambaBlock sees seq_len == 1,
    # which is the assumption that lets the kernel drop the dA / A / fc4 path.
    xf = x.reshape(-1, d_model).astype(jnp.float32)
    n_rows = xf.shape[0]

    kp = _prep_kernel_params(params)
    w_args = [kp[k] for k in _WEIGHT_ORDER]

    # Lane-dense layout: rows on the 128-lane axis; pad rows to a multiple of tile_m.
    if n_rows < tile_m:
        tile_m = max(128, ((n_rows + 127) // 128) * 128)
    n_pad = ((n_rows + tile_m - 1) // tile_m) * tile_m
    x_t = jnp.pad(xf.T, ((0, 0), (0, n_pad - n_rows)))     # (d_model, n_pad)

    grid = (n_pad // tile_m,)

    def const_spec(arr):
        nd = arr.ndim
        return pl.BlockSpec(arr.shape, lambda i: (0,) * nd)   # weight stays VMEM-resident

    in_specs = ([pl.BlockSpec((d_model, tile_m), lambda i: (0, i))]
                + [const_spec(w) for w in w_args])
    out_specs = pl.BlockSpec((out_dim, tile_m), lambda i: (0, i))

    flops_per_row = 2 * (d_model * median
                         + 3 * (2 * median * median               # fused inp_proj | D
                                + median * median                 # conv_linear
                                + (median + 2 * state) * median   # fused fc1|fc2|fc3
                                + median * median)                # out_proj
                         + median * out_dim)
    weight_bytes = sum(int(w.size) * w.dtype.itemsize for w in w_args)
    cost = pl.CostEstimate(
        flops=int(n_pad * flops_per_row),
        transcendentals=int(n_pad * 12 * median),
        bytes_accessed=int(x_t.size) * 4 + out_dim * n_pad * 4 + weight_bytes)

    out_t = pl.pallas_call(
        _pure_mamba_kernel,
        out_shape=jax.ShapeDtypeStruct((out_dim, n_pad), jnp.float32),
        grid=grid,
        in_specs=in_specs,
        out_specs=out_specs,
        compiler_params=pltpu.CompilerParams(
            dimension_semantics=("parallel",),
            vmem_limit_bytes=32 * 1024 * 1024),
        cost_estimate=cost,
    )(x_t, *w_args)

    out = out_t[:, :n_rows].T
    return (out, out, out, out, out)


# ----------------------------------------------------------------------------
# Faithful full-f32 reference (including the exp(delta*A) path), matching PyTorch.
# ----------------------------------------------------------------------------
def reference_forward_f32(x, params):
    HI = jax.lax.Precision.HIGHEST
    d_model = params['lin1_w'].shape[0]
    median = params['inp_w'].shape[-1]
    state = params['fc2_w'].shape[-1]
    h = x.reshape(-1, d_model).astype(jnp.float32)

    def dot(a, w):
        return jnp.dot(a, w, precision=HI)

    def block(xin, blk):
        ms = jnp.mean(xin * xin, axis=-1, keepdims=True)
        xn = xin * jax.lax.rsqrt(ms + EPS) * params['norm_w'][blk]
        xp = dot(xn, params['inp_w'][blk]) + params['inp_b'][blk]
        cw = params['conv_w'][blk]
        zero = jnp.zeros_like(xp[:, :1])
        left = jnp.concatenate([zero, xp[:, :-1]], axis=1)
        right = jnp.concatenate([xp[:, 1:], zero], axis=1)
        xc = cw[0] * left + cw[1] * xp + cw[2] * right + params['conv_b'][blk]
        xco = dot(_silu(xc), params['convlin_w'][blk]) + params['convlin_b'][blk]
        delta = _softplus(dot(xco, params['fc1_w'][blk]) + params['fc1_b'][blk])
        B = dot(xco, params['fc2_w'][blk]) + params['fc2_b'][blk]
        C = dot(xco, params['fc3_w'][blk]) + params['fc3_b'][blk]
        dB = delta[:, :, None] * B[:, None, :]                         # (N, m, s)
        dA = jnp.exp(delta[:, :, None] * params['ssm_A'][blk][None])   # (N, m, s)
        hs = jnp.zeros((xco.shape[0], median, state), jnp.float32)
        hs = dA * hs + xco[:, :, None] * dB
        x_ssm = jnp.sum(C[:, None, :] * hs, axis=-1)                   # (N, m)
        x_comb = _silu(x_ssm) * _silu(dot(xn, params['d_w'][blk]) + params['d_b'][blk])
        return dot(x_comb, params['outp_w'][blk]) + params['outp_b'][blk]

    x1 = _leaky(dot(h, params['lin1_w']) + params['lin1_b'])
    x2 = block(x1, 0) + x1
    x3 = block(x2, 1) + x2
    hh = block(x3, 2) + x3
    return _leaky(dot(hh, params['out1_w']) + params['out1_b'])


# ----------------------------------------------------------------------------
# Deterministic PyTorch-like initialization.
# ----------------------------------------------------------------------------
def init_params(key, d_model, median, state, output_size):
    def uniform(k, shape, bound):
        return jax.random.uniform(k, shape, jnp.float32, -bound, bound)

    def linear(k, fan_in, fan_out, bias_value=None):
        bound = 1.0 / math.sqrt(fan_in)
        k1, k2 = jax.random.split(k)
        w = uniform(k1, (fan_in, fan_out), bound)          # stored (in, out)
        if bias_value is None:
            b = uniform(k2, (1, fan_out), bound)
        else:
            b = jnp.full((1, fan_out), bias_value, jnp.float32)
        return w, b

    keys = jax.random.split(key, 3)
    lin1_w, lin1_b = linear(keys[0], d_model, median)
    out1_w, out1_b = linear(keys[1], median, output_size)

    names = ['norm_w', 'inp_w', 'inp_b', 'conv_w', 'conv_b',
             'convlin_w', 'convlin_b', 'd_w', 'd_b',
             'fc1_w', 'fc1_b', 'fc2_w', 'fc2_b', 'fc3_w', 'fc3_b',
             'outp_w', 'outp_b', 'ssm_A']
    blocks = {n: [] for n in names}
    bkey = keys[2]
    for _ in range(3):
        bkey, k_inp, k_conv, k_cl, k_d, k1, k2, k3, kA, k_out = jax.random.split(bkey, 10)
        inp_w, inp_b = linear(k_inp, median, median)
        kc = 1.0 / math.sqrt(1 * 3)                        # Conv1d fan_in = in_ch*kernel
        kcw, kcb = jax.random.split(k_conv)
        conv_w = uniform(kcw, (3,), kc)
        conv_b = uniform(kcb, (), kc)
        convlin_w, convlin_b = linear(k_cl, median, median)
        d_w, d_b = linear(k_d, median, median)
        fc1_w, fc1_b = linear(k1, median, median)
        fc2_w, fc2_b = linear(k2, median, state)
        fc3_w, fc3_b = linear(k3, median, state)
        outp_w, outp_b = linear(k_out, median, median, bias_value=1.0)  # out_proj.bias = 1
        ssm_A = uniform(kA, (median, state), math.sqrt(6.0 / (median + state)))
        vals = dict(norm_w=jnp.ones((1, median), jnp.float32),
                    inp_w=inp_w, inp_b=inp_b, conv_w=conv_w, conv_b=conv_b,
                    convlin_w=convlin_w, convlin_b=convlin_b, d_w=d_w, d_b=d_b,
                    fc1_w=fc1_w, fc1_b=fc1_b, fc2_w=fc2_w, fc2_b=fc2_b,
                    fc3_w=fc3_w, fc3_b=fc3_b, outp_w=outp_w, outp_b=outp_b,
                    ssm_A=ssm_A)
        for n in names:
            blocks[n].append(vals[n])

    params = dict(lin1_w=lin1_w, lin1_b=lin1_b, out1_w=out1_w, out1_b=out1_b)
    for n in names:
        params[n] = jnp.stack(blocks[n], axis=0)
    return params


# ----------------------------------------------------------------------------
if __name__ == "__main__":
    d_model, median_size, state_size, output_size = 8, 32, 16, 4
    batch, seq = 2, 8            # forward reshapes input to (batch*seq, 1, d_model)

    key = jax.random.PRNGKey(0)
    kparam, kx = jax.random.split(key)
    params = init_params(kparam, d_model, median_size, state_size, output_size)
    x = jax.random.normal(kx, (batch, seq, d_model), jnp.float32)

    outs = pure_mamba_forward(x, params)
    out = jax.block_until_ready(outs[0])

    assert len(outs) == 5
    assert out.shape == (batch * seq, output_size)

    # Check 1 (tight): identical math (folded conv / fused matmuls / bf16 weights) in
    # plain JAX — validates the Pallas lowering itself.
    kp_prep = _prep_kernel_params(params)
    xf = x.reshape(-1, d_model).astype(jnp.float32)
    ref_same = jax.block_until_ready(
        _forward_math(xf.T, *[kp_prep[k] for k in _WEIGHT_ORDER]).T)
    err_same = float(jnp.max(jnp.abs(out - ref_same)))
    assert jnp.allclose(out, ref_same, atol=2e-3, rtol=2e-3), \
        f"Pallas vs same-math JAX reference mismatch (max abs err {err_same})"

    # Check 2 (loose): faithful full-f32 PyTorch-equivalent reference (incl. the dA
    # path); tolerance absorbs the intended bf16-MXU drift of the kernel.
    ref_f32 = jax.block_until_ready(reference_forward_f32(x, params))
    err_f32 = float(jnp.max(jnp.abs(out - ref_f32)))
    assert jnp.allclose(out, ref_f32, atol=2e-1, rtol=2e-1), \
        f"Pallas vs faithful f32 reference mismatch (max abs err {err_f32})"

    print("KERNEL_OK")
</pallas_src>

<mosaic_0001>
module attributes {stable_mosaic.version = 11 : i64} {
  func.func @_pure_mamba_kernel(%arg0: i32, %arg1: memref<8x128xf32, #tpu.memory_space<vmem>>, %arg2: memref<32x8xbf16, #tpu.memory_space<vmem>>, %arg3: memref<32x1xf32, #tpu.memory_space<vmem>>, %arg4: memref<4x32xbf16, #tpu.memory_space<vmem>>, %arg5: memref<4x1xf32, #tpu.memory_space<vmem>>, %arg6: memref<3x32x1xf32, #tpu.memory_space<vmem>>, %arg7: memref<3x64x32xbf16, #tpu.memory_space<vmem>>, %arg8: memref<3x64x1xf32, #tpu.memory_space<vmem>>, %arg9: memref<3x32x32xbf16, #tpu.memory_space<vmem>>, %arg10: memref<3x32x1xf32, #tpu.memory_space<vmem>>, %arg11: memref<3x64x32xbf16, #tpu.memory_space<vmem>>, %arg12: memref<3x64x1xf32, #tpu.memory_space<vmem>>, %arg13: memref<3x32x32xbf16, #tpu.memory_space<vmem>>, %arg14: memref<3x32x1xf32, #tpu.memory_space<vmem>>, %arg15: memref<4x128xf32, #tpu.memory_space<vmem>>) attributes {dimension_semantics = [#tpu.dimension_semantics<parallel>], iteration_bounds = array<i64: 1>, scalar_prefetch = 0 : i64, scratch_operands = 0 : i64, tpu.core_type = #tpu.core_type<tc>, window_params = [{transform_indices = @transform_0, window_bounds = array<i64: 8, 128>}, {pipeline_mode = #tpu.pipeline_mode<synchronous>, transform_indices = @transform_1, window_bounds = array<i64: 32, 8>}, {pipeline_mode = #tpu.pipeline_mode<synchronous>, transform_indices = @transform_2, window_bounds = array<i64: 32, 1>}, {pipeline_mode = #tpu.pipeline_mode<synchronous>, transform_indices = @transform_3, window_bounds = array<i64: 4, 32>}, {pipeline_mode = #tpu.pipeline_mode<synchronous>, transform_indices = @transform_4, window_bounds = array<i64: 4, 1>}, {pipeline_mode = #tpu.pipeline_mode<synchronous>, transform_indices = @transform_5, window_bounds = array<i64: 3, 32, 1>}, {pipeline_mode = #tpu.pipeline_mode<synchronous>, transform_indices = @transform_6, window_bounds = array<i64: 3, 64, 32>}, {pipeline_mode = #tpu.pipeline_mode<synchronous>, transform_indices = @transform_7, window_bounds = array<i64: 3, 64, 1>}, {pipeline_mode = #tpu.pipeline_mode<synchronous>, transform_indices = @transform_8, window_bounds = array<i64: 3, 32, 32>}, {pipeline_mode = #tpu.pipeline_mode<synchronous>, transform_indices = @transform_9, window_bounds = array<i64: 3, 32, 1>}, {pipeline_mode = #tpu.pipeline_mode<synchronous>, transform_indices = @transform_10, window_bounds = array<i64: 3, 64, 32>}, {pipeline_mode = #tpu.pipeline_mode<synchronous>, transform_indices = @transform_11, window_bounds = array<i64: 3, 64, 1>}, {pipeline_mode = #tpu.pipeline_mode<synchronous>, transform_indices = @transform_12, window_bounds = array<i64: 3, 32, 32>}, {pipeline_mode = #tpu.pipeline_mode<synchronous>, transform_indices = @transform_13, window_bounds = array<i64: 3, 32, 1>}, {transform_indices = @transform_14, window_bounds = array<i64: 4, 128>}]} {
    %c0 = arith.constant 0 : index
    %c0_0 = arith.constant 0 : index
    %0 = vector.load %arg1[%c0, %c0_0] : memref<8x128xf32, #tpu.memory_space<vmem>>, vector<8x128xf32>
    %c0_1 = arith.constant 0 : index
    %c0_2 = arith.constant 0 : index
    %1 = vector.load %arg2[%c0_1, %c0_2] : memref<32x8xbf16, #tpu.memory_space<vmem>>, vector<32x8xbf16>
    %c0_3 = arith.constant 0 : index
    %c0_4 = arith.constant 0 : index
    %2 = vector.load %arg3[%c0_3, %c0_4] : memref<32x1xf32, #tpu.memory_space<vmem>>, vector<32x1xf32>
    %c0_5 = arith.constant 0 : index
    %c0_6 = arith.constant 0 : index
    %3 = vector.load %arg4[%c0_5, %c0_6] : memref<4x32xbf16, #tpu.memory_space<vmem>>, vector<4x32xbf16>
    %c0_7 = arith.constant 0 : index
    %c0_8 = arith.constant 0 : index
    %4 = vector.load %arg5[%c0_7, %c0_8] : memref<4x1xf32, #tpu.memory_space<vmem>>, vector<4x1xf32>
    %c0_9 = arith.constant 0 : index
    %c0_10 = arith.constant 0 : index
    %c0_11 = arith.constant 0 : index
    %5 = vector.load %arg6[%c0_9, %c0_10, %c0_11] : memref<3x32x1xf32, #tpu.memory_space<vmem>>, vector<3x32x1xf32>
    %c0_12 = arith.constant 0 : index
    %c0_13 = arith.constant 0 : index
    %c0_14 = arith.constant 0 : index
    %6 = vector.load %arg7[%c0_12, %c0_13, %c0_14] : memref<3x64x32xbf16, #tpu.memory_space<vmem>>, vector<3x64x32xbf16>
    %c0_15 = arith.constant 0 : index
    %c0_16 = arith.constant 0 : index
    %c0_17 = arith.constant 0 : index
    %7 = vector.load %arg8[%c0_15, %c0_16, %c0_17] : memref<3x64x1xf32, #tpu.memory_space<vmem>>, vector<3x64x1xf32>
    %c0_18 = arith.constant 0 : index
    %c0_19 = arith.constant 0 : index
    %c0_20 = arith.constant 0 : index
    %8 = vector.load %arg9[%c0_18, %c0_19, %c0_20] : memref<3x32x32xbf16, #tpu.memory_space<vmem>>, vector<3x32x32xbf16>
    %c0_21 = arith.constant 0 : index
    %c0_22 = arith.constant 0 : index
    %c0_23 = arith.constant 0 : index
    %9 = vector.load %arg10[%c0_21, %c0_22, %c0_23] : memref<3x32x1xf32, #tpu.memory_space<vmem>>, vector<3x32x1xf32>
    %c0_24 = arith.constant 0 : index
    %c0_25 = arith.constant 0 : index
    %c0_26 = arith.constant 0 : index
    %10 = vector.load %arg11[%c0_24, %c0_25, %c0_26] : memref<3x64x32xbf16, #tpu.memory_space<vmem>>, vector<3x64x32xbf16>
    %c0_27 = arith.constant 0 : index
    %c0_28 = arith.constant 0 : index
    %c0_29 = arith.constant 0 : index
    %11 = vector.load %arg12[%c0_27, %c0_28, %c0_29] : memref<3x64x1xf32, #tpu.memory_space<vmem>>, vector<3x64x1xf32>
    %c0_30 = arith.constant 0 : index
    %c0_31 = arith.constant 0 : index
    %c0_32 = arith.constant 0 : index
    %12 = vector.load %arg13[%c0_30, %c0_31, %c0_32] : memref<3x32x32xbf16, #tpu.memory_space<vmem>>, vector<3x32x32xbf16>
    %c0_33 = arith.constant 0 : index
    %c0_34 = arith.constant 0 : index
    %c0_35 = arith.constant 0 : index
    %13 = vector.load %arg14[%c0_33, %c0_34, %c0_35] : memref<3x32x1xf32, #tpu.memory_space<vmem>>, vector<3x32x1xf32>
    %14 = arith.truncf %0 : vector<8x128xf32> to vector<8x128xbf16>
    %cst = arith.constant dense<0.000000e+00> : vector<32x128xf32>
    %15 = tpu.matmul %1, %14, %cst {dimension_numbers = #tpu.dot_dimension_numbers<[1], [0], [0], [1], [0, 0, 1, 1], [], []>} : vector<32x8xbf16>, vector<8x128xbf16>, vector<32x128xf32> -> vector<32x128xf32>
    %16 = vector.broadcast %2 : vector<32x1xf32> to vector<32x128xf32>
    %17 = arith.addf %15, %16 : vector<32x128xf32>
    %cst_36 = arith.constant 0.000000e+00 : f32
    %18 = vector.broadcast %cst_36 : f32 to vector<32x128xf32>
    %19 = arith.cmpf oge, %17, %18 : vector<32x128xf32>
    %cst_37 = arith.constant 0.00999999977 : f32
    %20 = vector.broadcast %cst_37 : f32 to vector<32x128xf32>
    %21 = arith.mulf %20, %17 : vector<32x128xf32>
    %22 = arith.select %19, %17, %21 : vector<32x128xi1>, vector<32x128xf32>
    %23 = arith.mulf %22, %22 : vector<32x128xf32>
    %cst_38 = arith.constant dense<0.000000e+00> : vector<128xf32>
    %24 = vector.multi_reduction <add>, %23, %cst_38 [0] : vector<32x128xf32> to vector<128xf32>
    %25 = vector.shape_cast %24 : vector<128xf32> to vector<1x128xf32>
    %cst_39 = arith.constant 3.200000e+01 : f32
    %26 = vector.broadcast %cst_39 : f32 to vector<1x128xf32>
    %27 = arith.divf %25, %26 : vector<1x128xf32>
    %cst_40 = arith.constant 9.99999974E-6 : f32
    %28 = vector.broadcast %cst_40 : f32 to vector<1x128xf32>
    %29 = arith.addf %27, %28 : vector<1x128xf32>
    %30 = math.rsqrt %29 : vector<1x128xf32>
    %31 = vector.broadcast %30 : vector<1x128xf32> to vector<32x128xf32>
    %32 = arith.mulf %22, %31 : vector<32x128xf32>
    %33 = vector.extract_strided_slice %5 {offsets = [0, 0, 0], sizes = [1, 32, 1], strides = [1, 1, 1]} : vector<3x32x1xf32> to vector<1x32x1xf32>
    %34 = vector.shape_cast %33 : vector<1x32x1xf32> to vector<32x1xf32>
    %35 = vector.broadcast %34 : vector<32x1xf32> to vector<32x128xf32>
    %36 = arith.mulf %32, %35 : vector<32x128xf32>
    %37 = vector.extract_strided_slice %6 {offsets = [0, 0, 0], sizes = [1, 64, 32], strides = [1, 1, 1]} : vector<3x64x32xbf16> to vector<1x64x32xbf16>
    %38 = vector.shape_cast %37 : vector<1x64x32xbf16> to vector<64x32xbf16>
    %39 = arith.truncf %36 : vector<32x128xf32> to vector<32x128xbf16>
    %cst_41 = arith.constant dense<0.000000e+00> : vector<64x128xf32>
    %40 = tpu.matmul %38, %39, %cst_41 {dimension_numbers = #tpu.dot_dimension_numbers<[1], [0], [0], [1], [0, 0, 1, 1], [], []>} : vector<64x32xbf16>, vector<32x128xbf16>, vector<64x128xf32> -> vector<64x128xf32>
    %41 = vector.extract_strided_slice %7 {offsets = [0, 0, 0], sizes = [1, 64, 1], strides = [1, 1, 1]} : vector<3x64x1xf32> to vector<1x64x1xf32>
    %42 = vector.shape_cast %41 : vector<1x64x1xf32> to vector<64x1xf32>
    %43 = vector.broadcast %42 : vector<64x1xf32> to vector<64x128xf32>
    %44 = arith.addf %40, %43 : vector<64x128xf32>
    %45 = vector.extract_strided_slice %44 {offsets = [0, 0], sizes = [32, 128], strides = [1, 1]} : vector<64x128xf32> to vector<32x128xf32>
    %46 = vector.extract_strided_slice %44 {offsets = [32, 0], sizes = [32, 128], strides = [1, 1]} : vector<64x128xf32> to vector<32x128xf32>
    %47 = vector.extract_strided_slice %8 {offsets = [0, 0, 0], sizes = [1, 32, 32], strides = [1, 1, 1]} : vector<3x32x32xbf16> to vector<1x32x32xbf16>
    %48 = vector.shape_cast %47 : vector<1x32x32xbf16> to vector<32x32xbf16>
    %cst_42 = arith.constant 0.000000e+00 : f32
    %49 = vector.broadcast %cst_42 : f32 to vector<32x128xf32>
    %50 = arith.subf %49, %45 : vector<32x128xf32>
    %51 = math.exp %50 : vector<32x128xf32>
    %cst_43 = arith.constant 1.000000e+00 : f32
    %52 = vector.broadcast %cst_43 : f32 to vector<32x128xf32>
    %53 = arith.addf %52, %51 : vector<32x128xf32>
    %cst_44 = arith.constant 1.000000e+00 : f32
    %54 = vector.broadcast %cst_44 : f32 to vector<32x128xf32>
    %55 = arith.divf %54, %53 : vector<32x128xf32>
    %56 = arith.mulf %45, %55 : vector<32x128xf32>
    %57 = arith.truncf %56 : vector<32x128xf32> to vector<32x128xbf16>
    %cst_45 = arith.constant dense<0.000000e+00> : vector<32x128xf32>
    %58 = tpu.matmul %48, %57, %cst_45 {dimension_numbers = #tpu.dot_dimension_numbers<[1], [0], [0], [1], [0, 0, 1, 1], [], []>} : vector<32x32xbf16>, vector<32x128xbf16>, vector<32x128xf32> -> vector<32x128xf32>
    %59 = vector.extract_strided_slice %9 {offsets = [0, 0, 0], sizes = [1, 32, 1], strides = [1, 1, 1]} : vector<3x32x1xf32> to vector<1x32x1xf32>
    %60 = vector.shape_cast %59 : vector<1x32x1xf32> to vector<32x1xf32>
    %61 = vector.broadcast %60 : vector<32x1xf32> to vector<32x128xf32>
    %62 = arith.addf %58, %61 : vector<32x128xf32>
    %63 = vector.extract_strided_slice %10 {offsets = [0, 0, 0], sizes = [1, 64, 32], strides = [1, 1, 1]} : vector<3x64x32xbf16> to vector<1x64x32xbf16>
    %64 = vector.shape_cast %63 : vector<1x64x32xbf16> to vector<64x32xbf16>
    %65 = arith.truncf %62 : vector<32x128xf32> to vector<32x128xbf16>
    %cst_46 = arith.constant dense<0.000000e+00> : vector<64x128xf32>
    %66 = tpu.matmul %64, %65, %cst_46 {dimension_numbers = #tpu.dot_dimension_numbers<[1], [0], [0], [1], [0, 0, 1, 1], [], []>} : vector<64x32xbf16>, vector<32x128xbf16>, vector<64x128xf32> -> vector<64x128xf32>
    %67 = vector.extract_strided_slice %11 {offsets = [0, 0, 0], sizes = [1, 64, 1], strides = [1, 1, 1]} : vector<3x64x1xf32> to vector<1x64x1xf32>
    %68 = vector.shape_cast %67 : vector<1x64x1xf32> to vector<64x1xf32>
    %69 = vector.broadcast %68 : vector<64x1xf32> to vector<64x128xf32>
    %70 = arith.addf %66, %69 : vector<64x128xf32>
    %71 = vector.extract_strided_slice %70 {offsets = [0, 0], sizes = [32, 128], strides = [1, 1]} : vector<64x128xf32> to vector<32x128xf32>
    %cst_47 = arith.constant 0.000000e+00 : f32
    %72 = vector.broadcast %cst_47 : f32 to vector<32x128xf32>
    %73 = arith.maximumf %71, %72 : vector<32x128xf32>
    %74 = math.absf %71 : vector<32x128xf32>
    %cst_48 = arith.constant 0.000000e+00 : f32
    %75 = vector.broadcast %cst_48 : f32 to vector<32x128xf32>
    %76 = arith.subf %75, %74 : vector<32x128xf32>
    %77 = math.exp %76 : vector<32x128xf32>
    %cst_49 = arith.constant 1.000000e+00 : f32
    %78 = vector.broadcast %cst_49 : f32 to vector<32x128xf32>
    %79 = arith.addf %78, %77 : vector<32x128xf32>
    %80 = math.log %79 : vector<32x128xf32>
    %81 = arith.addf %73, %80 : vector<32x128xf32>
    %82 = vector.extract_strided_slice %70 {offsets = [32, 0], sizes = [16, 128], strides = [1, 1]} : vector<64x128xf32> to vector<16x128xf32>
    %83 = vector.extract_strided_slice %70 {offsets = [48, 0], sizes = [16, 128], strides = [1, 1]} : vector<64x128xf32> to vector<16x128xf32>
    %84 = arith.mulf %82, %83 : vector<16x128xf32>
    %cst_50 = arith.constant dense<0.000000e+00> : vector<128xf32>
    %85 = vector.multi_reduction <add>, %84, %cst_50 [0] : vector<16x128xf32> to vector<128xf32>
    %86 = vector.shape_cast %85 : vector<128xf32> to vector<1x128xf32>
    %87 = arith.mulf %62, %81 : vector<32x128xf32>
    %88 = vector.broadcast %86 : vector<1x128xf32> to vector<32x128xf32>
    %89 = arith.mulf %87, %88 : vector<32x128xf32>
    %cst_51 = arith.constant 0.000000e+00 : f32
    %90 = vector.broadcast %cst_51 : f32 to vector<32x128xf32>
    %91 = arith.subf %90, %89 : vector<32x128xf32>
    %92 = math.exp %91 : vector<32x128xf32>
    %cst_52 = arith.constant 1.000000e+00 : f32
    %93 = vector.broadcast %cst_52 : f32 to vector<32x128xf32>
    %94 = arith.addf %93, %92 : vector<32x128xf32>
    %cst_53 = arith.constant 1.000000e+00 : f32
    %95 = vector.broadcast %cst_53 : f32 to vector<32x128xf32>
    %96 = arith.divf %95, %94 : vector<32x128xf32>
    %97 = arith.mulf %89, %96 : vector<32x128xf32>
    %cst_54 = arith.constant 0.000000e+00 : f32
    %98 = vector.broadcast %cst_54 : f32 to vector<32x128xf32>
    %99 = arith.subf %98, %46 : vector<32x128xf32>
    %100 = math.exp %99 : vector<32x128xf32>
    %cst_55 = arith.constant 1.000000e+00 : f32
    %101 = vector.broadcast %cst_55 : f32 to vector<32x128xf32>
    %102 = arith.addf %101, %100 : vector<32x128xf32>
    %cst_56 = arith.constant 1.000000e+00 : f32
    %103 = vector.broadcast %cst_56 : f32 to vector<32x128xf32>
    %104 = arith.divf %103, %102 : vector<32x128xf32>
    %105 = arith.mulf %46, %104 : vector<32x128xf32>
    %106 = arith.mulf %97, %105 : vector<32x128xf32>
    %107 = vector.extract_strided_slice %12 {offsets = [0, 0, 0], sizes = [1, 32, 32], strides = [1, 1, 1]} : vector<3x32x32xbf16> to vector<1x32x32xbf16>
    %108 = vector.shape_cast %107 : vector<1x32x32xbf16> to vector<32x32xbf16>
    %109 = arith.truncf %106 : vector<32x128xf32> to vector<32x128xbf16>
    %cst_57 = arith.constant dense<0.000000e+00> : vector<32x128xf32>
    %110 = tpu.matmul %108, %109, %cst_57 {dimension_numbers = #tpu.dot_dimension_numbers<[1], [0], [0], [1], [0, 0, 1, 1], [], []>} : vector<32x32xbf16>, vector<32x128xbf16>, vector<32x128xf32> -> vector<32x128xf32>
    %111 = vector.extract_strided_slice %13 {offsets = [0, 0, 0], sizes = [1, 32, 1], strides = [1, 1, 1]} : vector<3x32x1xf32> to vector<1x32x1xf32>
    %112 = vector.shape_cast %111 : vector<1x32x1xf32> to vector<32x1xf32>
    %113 = vector.broadcast %112 : vector<32x1xf32> to vector<32x128xf32>
    %114 = arith.addf %110, %113 : vector<32x128xf32>
    %115 = arith.addf %114, %22 : vector<32x128xf32>
    %116 = arith.mulf %115, %115 : vector<32x128xf32>
    %cst_58 = arith.constant dense<0.000000e+00> : vector<128xf32>
    %117 = vector.multi_reduction <add>, %116, %cst_58 [0] : vector<32x128xf32> to vector<128xf32>
    %118 = vector.shape_cast %117 : vector<128xf32> to vector<1x128xf32>
    %cst_59 = arith.constant 3.200000e+01 : f32
    %119 = vector.broadcast %cst_59 : f32 to vector<1x128xf32>
    %120 = arith.divf %118, %119 : vector<1x128xf32>
    %cst_60 = arith.constant 9.99999974E-6 : f32
    %121 = vector.broadcast %cst_60 : f32 to vector<1x128xf32>
    %122 = arith.addf %120, %121 : vector<1x128xf32>
    %123 = math.rsqrt %122 : vector<1x128xf32>
    %124 = vector.broadcast %123 : vector<1x128xf32> to vector<32x128xf32>
    %125 = arith.mulf %115, %124 : vector<32x128xf32>
    %126 = vector.extract_strided_slice %5 {offsets = [1, 0, 0], sizes = [1, 32, 1], strides = [1, 1, 1]} : vector<3x32x1xf32> to vector<1x32x1xf32>
    %127 = vector.shape_cast %126 : vector<1x32x1xf32> to vector<32x1xf32>
    %128 = vector.broadcast %127 : vector<32x1xf32> to vector<32x128xf32>
    %129 = arith.mulf %125, %128 : vector<32x128xf32>
    %130 = vector.extract_strided_slice %6 {offsets = [1, 0, 0], sizes = [1, 64, 32], strides = [1, 1, 1]} : vector<3x64x32xbf16> to vector<1x64x32xbf16>
    %131 = vector.shape_cast %130 : vector<1x64x32xbf16> to vector<64x32xbf16>
    %132 = arith.truncf %129 : vector<32x128xf32> to vector<32x128xbf16>
    %cst_61 = arith.constant dense<0.000000e+00> : vector<64x128xf32>
    %133 = tpu.matmul %131, %132, %cst_61 {dimension_numbers = #tpu.dot_dimension_numbers<[1], [0], [0], [1], [0, 0, 1, 1], [], []>} : vector<64x32xbf16>, vector<32x128xbf16>, vector<64x128xf32> -> vector<64x128xf32>
    %134 = vector.extract_strided_slice %7 {offsets = [1, 0, 0], sizes = [1, 64, 1], strides = [1, 1, 1]} : vector<3x64x1xf32> to vector<1x64x1xf32>
    %135 = vector.shape_cast %134 : vector<1x64x1xf32> to vector<64x1xf32>
    %136 = vector.broadcast %135 : vector<64x1xf32> to vector<64x128xf32>
    %137 = arith.addf %133, %136 : vector<64x128xf32>
    %138 = vector.extract_strided_slice %137 {offsets = [0, 0], sizes = [32, 128], strides = [1, 1]} : vector<64x128xf32> to vector<32x128xf32>
    %139 = vector.extract_strided_slice %137 {offsets = [32, 0], sizes = [32, 128], strides = [1, 1]} : vector<64x128xf32> to vector<32x128xf32>
    %140 = vector.extract_strided_slice %8 {offsets = [1, 0, 0], sizes = [1, 32, 32], strides = [1, 1, 1]} : vector<3x32x32xbf16> to vector<1x32x32xbf16>
    %141 = vector.shape_cast %140 : vector<1x32x32xbf16> to vector<32x32xbf16>
    %cst_62 = arith.constant 0.000000e+00 : f32
    %142 = vector.broadcast %cst_62 : f32 to vector<32x128xf32>
    %143 = arith.subf %142, %138 : vector<32x128xf32>
    %144 = math.exp %143 : vector<32x128xf32>
    %cst_63 = arith.constant 1.000000e+00 : f32
    %145 = vector.broadcast %cst_63 : f32 to vector<32x128xf32>
    %146 = arith.addf %145, %144 : vector<32x128xf32>
    %cst_64 = arith.constant 1.000000e+00 : f32
    %147 = vector.broadcast %cst_64 : f32 to vector<32x128xf32>
    %148 = arith.divf %147, %146 : vector<32x128xf32>
    %149 = arith.mulf %138, %148 : vector<32x128xf32>
    %150 = arith.truncf %149 : vector<32x128xf32> to vector<32x128xbf16>
    %cst_65 = arith.constant dense<0.000000e+00> : vector<32x128xf32>
    %151 = tpu.matmul %141, %150, %cst_65 {dimension_numbers = #tpu.dot_dimension_numbers<[1], [0], [0], [1], [0, 0, 1, 1], [], []>} : vector<32x32xbf16>, vector<32x128xbf16>, vector<32x128xf32> -> vector<32x128xf32>
    %152 = vector.extract_strided_slice %9 {offsets = [1, 0, 0], sizes = [1, 32, 1], strides = [1, 1, 1]} : vector<3x32x1xf32> to vector<1x32x1xf32>
    %153 = vector.shape_cast %152 : vector<1x32x1xf32> to vector<32x1xf32>
    %154 = vector.broadcast %153 : vector<32x1xf32> to vector<32x128xf32>
    %155 = arith.addf %151, %154 : vector<32x128xf32>
    %156 = vector.extract_strided_slice %10 {offsets = [1, 0, 0], sizes = [1, 64, 32], strides = [1, 1, 1]} : vector<3x64x32xbf16> to vector<1x64x32xbf16>
    %157 = vector.shape_cast %156 : vector<1x64x32xbf16> to vector<64x32xbf16>
    %158 = arith.truncf %155 : vector<32x128xf32> to vector<32x128xbf16>
    %cst_66 = arith.constant dense<0.000000e+00> : vector<64x128xf32>
    %159 = tpu.matmul %157, %158, %cst_66 {dimension_numbers = #tpu.dot_dimension_numbers<[1], [0], [0], [1], [0, 0, 1, 1], [], []>} : vector<64x32xbf16>, vector<32x128xbf16>, vector<64x128xf32> -> vector<64x128xf32>
    %160 = vector.extract_strided_slice %11 {offsets = [1, 0, 0], sizes = [1, 64, 1], strides = [1, 1, 1]} : vector<3x64x1xf32> to vector<1x64x1xf32>
    %161 = vector.shape_cast %160 : vector<1x64x1xf32> to vector<64x1xf32>
    %162 = vector.broadcast %161 : vector<64x1xf32> to vector<64x128xf32>
    %163 = arith.addf %159, %162 : vector<64x128xf32>
    %164 = vector.extract_strided_slice %163 {offsets = [0, 0], sizes = [32, 128], strides = [1, 1]} : vector<64x128xf32> to vector<32x128xf32>
    %cst_67 = arith.constant 0.000000e+00 : f32
    %165 = vector.broadcast %cst_67 : f32 to vector<32x128xf32>
    %166 = arith.maximumf %164, %165 : vector<32x128xf32>
    %167 = math.absf %164 : vector<32x128xf32>
    %cst_68 = arith.constant 0.000000e+00 : f32
    %168 = vector.broadcast %cst_68 : f32 to vector<32x128xf32>
    %169 = arith.subf %168, %167 : vector<32x128xf32>
    %170 = math.exp %169 : vector<32x128xf32>
    %cst_69 = arith.constant 1.000000e+00 : f32
    %171 = vector.broadcast %cst_69 : f32 to vector<32x128xf32>
    %172 = arith.addf %171, %170 : vector<32x128xf32>
    %173 = math.log %172 : vector<32x128xf32>
    %174 = arith.addf %166, %173 : vector<32x128xf32>
    %175 = vector.extract_strided_slice %163 {offsets = [32, 0], sizes = [16, 128], strides = [1, 1]} : vector<64x128xf32> to vector<16x128xf32>
    %176 = vector.extract_strided_slice %163 {offsets = [48, 0], sizes = [16, 128], strides = [1, 1]} : vector<64x128xf32> to vector<16x128xf32>
    %177 = arith.mulf %175, %176 : vector<16x128xf32>
    %cst_70 = arith.constant dense<0.000000e+00> : vector<128xf32>
    %178 = vector.multi_reduction <add>, %177, %cst_70 [0] : vector<16x128xf32> to vector<128xf32>
    %179 = vector.shape_cast %178 : vector<128xf32> to vector<1x128xf32>
    %180 = arith.mulf %155, %174 : vector<32x128xf32>
    %181 = vector.broadcast %179 : vector<1x128xf32> to vector<32x128xf32>
    %182 = arith.mulf %180, %181 : vector<32x128xf32>
    %cst_71 = arith.constant 0.000000e+00 : f32
    %183 = vector.broadcast %cst_71 : f32 to vector<32x128xf32>
    %184 = arith.subf %183, %182 : vector<32x128xf32>
    %185 = math.exp %184 : vector<32x128xf32>
    %cst_72 = arith.constant 1.000000e+00 : f32
    %186 = vector.broadcast %cst_72 : f32 to vector<32x128xf32>
    %187 = arith.addf %186, %185 : vector<32x128xf32>
    %cst_73 = arith.constant 1.000000e+00 : f32
    %188 = vector.broadcast %cst_73 : f32 to vector<32x128xf32>
    %189 = arith.divf %188, %187 : vector<32x128xf32>
    %190 = arith.mulf %182, %189 : vector<32x128xf32>
    %cst_74 = arith.constant 0.000000e+00 : f32
    %191 = vector.broadcast %cst_74 : f32 to vector<32x128xf32>
    %192 = arith.subf %191, %139 : vector<32x128xf32>
    %193 = math.exp %192 : vector<32x128xf32>
    %cst_75 = arith.constant 1.000000e+00 : f32
    %194 = vector.broadcast %cst_75 : f32 to vector<32x128xf32>
    %195 = arith.addf %194, %193 : vector<32x128xf32>
    %cst_76 = arith.constant 1.000000e+00 : f32
    %196 = vector.broadcast %cst_76 : f32 to vector<32x128xf32>
    %197 = arith.divf %196, %195 : vector<32x128xf32>
    %198 = arith.mulf %139, %197 : vector<32x128xf32>
    %199 = arith.mulf %190, %198 : vector<32x128xf32>
    %200 = vector.extract_strided_slice %12 {offsets = [1, 0, 0], sizes = [1, 32, 32], strides = [1, 1, 1]} : vector<3x32x32xbf16> to vector<1x32x32xbf16>
    %201 = vector.shape_cast %200 : vector<1x32x32xbf16> to vector<32x32xbf16>
    %202 = arith.truncf %199 : vector<32x128xf32> to vector<32x128xbf16>
    %cst_77 = arith.constant dense<0.000000e+00> : vector<32x128xf32>
    %203 = tpu.matmul %201, %202, %cst_77 {dimension_numbers = #tpu.dot_dimension_numbers<[1], [0], [0], [1], [0, 0, 1, 1], [], []>} : vector<32x32xbf16>, vector<32x128xbf16>, vector<32x128xf32> -> vector<32x128xf32>
    %204 = vector.extract_strided_slice %13 {offsets = [1, 0, 0], sizes = [1, 32, 1], strides = [1, 1, 1]} : vector<3x32x1xf32> to vector<1x32x1xf32>
    %205 = vector.shape_cast %204 : vector<1x32x1xf32> to vector<32x1xf32>
    %206 = vector.broadcast %205 : vector<32x1xf32> to vector<32x128xf32>
    %207 = arith.addf %203, %206 : vector<32x128xf32>
    %208 = arith.addf %207, %115 : vector<32x128xf32>
    %209 = arith.mulf %208, %208 : vector<32x128xf32>
    %cst_78 = arith.constant dense<0.000000e+00> : vector<128xf32>
    %210 = vector.multi_reduction <add>, %209, %cst_78 [0] : vector<32x128xf32> to vector<128xf32>
    %211 = vector.shape_cast %210 : vector<128xf32> to vector<1x128xf32>
    %cst_79 = arith.constant 3.200000e+01 : f32
    %212 = vector.broadcast %cst_79 : f32 to vector<1x128xf32>
    %213 = arith.divf %211, %212 : vector<1x128xf32>
    %cst_80 = arith.constant 9.99999974E-6 : f32
    %214 = vector.broadcast %cst_80 : f32 to vector<1x128xf32>
    %215 = arith.addf %213, %214 : vector<1x128xf32>
    %216 = math.rsqrt %215 : vector<1x128xf32>
    %217 = vector.broadcast %216 : vector<1x128xf32> to vector<32x128xf32>
    %218 = arith.mulf %208, %217 : vector<32x128xf32>
    %219 = vector.extract_strided_slice %5 {offsets = [2, 0, 0], sizes = [1, 32, 1], strides = [1, 1, 1]} : vector<3x32x1xf32> to vector<1x32x1xf32>
    %220 = vector.shape_cast %219 : vector<1x32x1xf32> to vector<32x1xf32>
    %221 = vector.broadcast %220 : vector<32x1xf32> to vector<32x128xf32>
    %222 = arith.mulf %218, %221 : vector<32x128xf32>
    %223 = vector.extract_strided_slice %6 {offsets = [2, 0, 0], sizes = [1, 64, 32], strides = [1, 1, 1]} : vector<3x64x32xbf16> to vector<1x64x32xbf16>
    %224 = vector.shape_cast %223 : vector<1x64x32xbf16> to vector<64x32xbf16>
    %225 = arith.truncf %222 : vector<32x128xf32> to vector<32x128xbf16>
    %cst_81 = arith.constant dense<0.000000e+00> : vector<64x128xf32>
    %226 = tpu.matmul %224, %225, %cst_81 {dimension_numbers = #tpu.dot_dimension_numbers<[1], [0], [0], [1], [0, 0, 1, 1], [], []>} : vector<64x32xbf16>, vector<32x128xbf16>, vector<64x128xf32> -> vector<64x128xf32>
    %227 = vector.extract_strided_slice %7 {offsets = [2, 0, 0], sizes = [1, 64, 1], strides = [1, 1, 1]} : vector<3x64x1xf32> to vector<1x64x1xf32>
    %228 = vector.shape_cast %227 : vector<1x64x1xf32> to vector<64x1xf32>
    %229 = vector.broadcast %228 : vector<64x1xf32> to vector<64x128xf32>
    %230 = arith.addf %226, %229 : vector<64x128xf32>
    %231 = vector.extract_strided_slice %230 {offsets = [0, 0], sizes = [32, 128], strides = [1, 1]} : vector<64x128xf32> to vector<32x128xf32>
    %232 = vector.extract_strided_slice %230 {offsets = [32, 0], sizes = [32, 128], strides = [1, 1]} : vector<64x128xf32> to vector<32x128xf32>
    %233 = vector.extract_strided_slice %8 {offsets = [2, 0, 0], sizes = [1, 32, 32], strides = [1, 1, 1]} : vector<3x32x32xbf16> to vector<1x32x32xbf16>
    %234 = vector.shape_cast %233 : vector<1x32x32xbf16> to vector<32x32xbf16>
    %cst_82 = arith.constant 0.000000e+00 : f32
    %235 = vector.broadcast %cst_82 : f32 to vector<32x128xf32>
    %236 = arith.subf %235, %231 : vector<32x128xf32>
    %237 = math.exp %236 : vector<32x128xf32>
    %cst_83 = arith.constant 1.000000e+00 : f32
    %238 = vector.broadcast %cst_83 : f32 to vector<32x128xf32>
    %239 = arith.addf %238, %237 : vector<32x128xf32>
    %cst_84 = arith.constant 1.000000e+00 : f32
    %240 = vector.broadcast %cst_84 : f32 to vector<32x128xf32>
    %241 = arith.divf %240, %239 : vector<32x128xf32>
    %242 = arith.mulf %231, %241 : vector<32x128xf32>
    %243 = arith.truncf %242 : vector<32x128xf32> to vector<32x128xbf16>
    %cst_85 = arith.constant dense<0.000000e+00> : vector<32x128xf32>
    %244 = tpu.matmul %234, %243, %cst_85 {dimension_numbers = #tpu.dot_dimension_numbers<[1], [0], [0], [1], [0, 0, 1, 1], [], []>} : vector<32x32xbf16>, vector<32x128xbf16>, vector<32x128xf32> -> vector<32x128xf32>
    %245 = vector.extract_strided_slice %9 {offsets = [2, 0, 0], sizes = [1, 32, 1], strides = [1, 1, 1]} : vector<3x32x1xf32> to vector<1x32x1xf32>
    %246 = vector.shape_cast %245 : vector<1x32x1xf32> to vector<32x1xf32>
    %247 = vector.broadcast %246 : vector<32x1xf32> to vector<32x128xf32>
    %248 = arith.addf %244, %247 : vector<32x128xf32>
    %249 = vector.extract_strided_slice %10 {offsets = [2, 0, 0], sizes = [1, 64, 32], strides = [1, 1, 1]} : vector<3x64x32xbf16> to vector<1x64x32xbf16>
    %250 = vector.shape_cast %249 : vector<1x64x32xbf16> to vector<64x32xbf16>
    %251 = arith.truncf %248 : vector<32x128xf32> to vector<32x128xbf16>
    %cst_86 = arith.constant dense<0.000000e+00> : vector<64x128xf32>
    %252 = tpu.matmul %250, %251, %cst_86 {dimension_numbers = #tpu.dot_dimension_numbers<[1], [0], [0], [1], [0, 0, 1, 1], [], []>} : vector<64x32xbf16>, vector<32x128xbf16>, vector<64x128xf32> -> vector<64x128xf32>
    %253 = vector.extract_strided_slice %11 {offsets = [2, 0, 0], sizes = [1, 64, 1], strides = [1, 1, 1]} : vector<3x64x1xf32> to vector<1x64x1xf32>
    %254 = vector.shape_cast %253 : vector<1x64x1xf32> to vector<64x1xf32>
    %255 = vector.broadcast %254 : vector<64x1xf32> to vector<64x128xf32>
    %256 = arith.addf %252, %255 : vector<64x128xf32>
    %257 = vector.extract_strided_slice %256 {offsets = [0, 0], sizes = [32, 128], strides = [1, 1]} : vector<64x128xf32> to vector<32x128xf32>
    %cst_87 = arith.constant 0.000000e+00 : f32
    %258 = vector.broadcast %cst_87 : f32 to vector<32x128xf32>
    %259 = arith.maximumf %257, %258 : vector<32x128xf32>
    %260 = math.absf %257 : vector<32x128xf32>
    %cst_88 = arith.constant 0.000000e+00 : f32
    %261 = vector.broadcast %cst_88 : f32 to vector<32x128xf32>
    %262 = arith.subf %261, %260 : vector<32x128xf32>
    %263 = math.exp %262 : vector<32x128xf32>
    %cst_89 = arith.constant 1.000000e+00 : f32
    %264 = vector.broadcast %cst_89 : f32 to vector<32x128xf32>
    %265 = arith.addf %264, %263 : vector<32x128xf32>
    %266 = math.log %265 : vector<32x128xf32>
    %267 = arith.addf %259, %266 : vector<32x128xf32>
    %268 = vector.extract_strided_slice %256 {offsets = [32, 0], sizes = [16, 128], strides = [1, 1]} : vector<64x128xf32> to vector<16x128xf32>
    %269 = vector.extract_strided_slice %256 {offsets = [48, 0], sizes = [16, 128], strides = [1, 1]} : vector<64x128xf32> to vector<16x128xf32>
    %270 = arith.mulf %268, %269 : vector<16x128xf32>
    %cst_90 = arith.constant dense<0.000000e+00> : vector<128xf32>
    %271 = vector.multi_reduction <add>, %270, %cst_90 [0] : vector<16x128xf32> to vector<128xf32>
    %272 = vector.shape_cast %271 : vector<128xf32> to vector<1x128xf32>
    %273 = arith.mulf %248, %267 : vector<32x128xf32>
    %274 = vector.broadcast %272 : vector<1x128xf32> to vector<32x128xf32>
    %275 = arith.mulf %273, %274 : vector<32x128xf32>
    %cst_91 = arith.constant 0.000000e+00 : f32
    %276 = vector.broadcast %cst_91 : f32 to vector<32x128xf32>
    %277 = arith.subf %276, %275 : vector<32x128xf32>
    %278 = math.exp %277 : vector<32x128xf32>
    %cst_92 = arith.constant 1.000000e+00 : f32
    %279 = vector.broadcast %cst_92 : f32 to vector<32x128xf32>
    %280 = arith.addf %279, %278 : vector<32x128xf32>
    %cst_93 = arith.constant 1.000000e+00 : f32
    %281 = vector.broadcast %cst_93 : f32 to vector<32x128xf32>
    %282 = arith.divf %281, %280 : vector<32x128xf32>
    %283 = arith.mulf %275, %282 : vector<32x128xf32>
    %cst_94 = arith.constant 0.000000e+00 : f32
    %284 = vector.broadcast %cst_94 : f32 to vector<32x128xf32>
    %285 = arith.subf %284, %232 : vector<32x128xf32>
    %286 = math.exp %285 : vector<32x128xf32>
    %cst_95 = arith.constant 1.000000e+00 : f32
    %287 = vector.broadcast %cst_95 : f32 to vector<32x128xf32>
    %288 = arith.addf %287, %286 : vector<32x128xf32>
    %cst_96 = arith.constant 1.000000e+00 : f32
    %289 = vector.broadcast %cst_96 : f32 to vector<32x128xf32>
    %290 = arith.divf %289, %288 : vector<32x128xf32>
    %291 = arith.mulf %232, %290 : vector<32x128xf32>
    %292 = arith.mulf %283, %291 : vector<32x128xf32>
    %293 = vector.extract_strided_slice %12 {offsets = [2, 0, 0], sizes = [1, 32, 32], strides = [1, 1, 1]} : vector<3x32x32xbf16> to vector<1x32x32xbf16>
    %294 = vector.shape_cast %293 : vector<1x32x32xbf16> to vector<32x32xbf16>
    %295 = arith.truncf %292 : vector<32x128xf32> to vector<32x128xbf16>
    %cst_97 = arith.constant dense<0.000000e+00> : vector<32x128xf32>
    %296 = tpu.matmul %294, %295, %cst_97 {dimension_numbers = #tpu.dot_dimension_numbers<[1], [0], [0], [1], [0, 0, 1, 1], [], []>} : vector<32x32xbf16>, vector<32x128xbf16>, vector<32x128xf32> -> vector<32x128xf32>
    %297 = vector.extract_strided_slice %13 {offsets = [2, 0, 0], sizes = [1, 32, 1], strides = [1, 1, 1]} : vector<3x32x1xf32> to vector<1x32x1xf32>
    %298 = vector.shape_cast %297 : vector<1x32x1xf32> to vector<32x1xf32>
    %299 = vector.broadcast %298 : vector<32x1xf32> to vector<32x128xf32>
    %300 = arith.addf %296, %299 : vector<32x128xf32>
    %301 = arith.addf %300, %208 : vector<32x128xf32>
    %302 = arith.truncf %301 : vector<32x128xf32> to vector<32x128xbf16>
    %cst_98 = arith.constant dense<0.000000e+00> : vector<4x128xf32>
    %303 = tpu.matmul %3, %302, %cst_98 {dimension_numbers = #tpu.dot_dimension_numbers<[1], [0], [0], [1], [0, 0, 1, 1], [], []>} : vector<4x32xbf16>, vector<32x128xbf16>, vector<4x128xf32> -> vector<4x128xf32>
    %304 = vector.broadcast %4 : vector<4x1xf32> to vector<4x128xf32>
    %305 = arith.addf %303, %304 : vector<4x128xf32>
    %cst_99 = arith.constant 0.000000e+00 : f32
    %306 = vector.broadcast %cst_99 : f32 to vector<4x128xf32>
    %307 = arith.cmpf oge, %305, %306 : vector<4x128xf32>
    %cst_100 = arith.constant 0.00999999977 : f32
    %308 = vector.broadcast %cst_100 : f32 to vector<4x128xf32>
    %309 = arith.mulf %308, %305 : vector<4x128xf32>
    %310 = arith.select %307, %305, %309 : vector<4x128xi1>, vector<4x128xf32>
    %c0_101 = arith.constant 0 : index
    %c0_102 = arith.constant 0 : index
    %311 = vector.load %arg15[%c0_101, %c0_102] : memref<4x128xf32, #tpu.memory_space<vmem>>, vector<4x128xf32>
    tpu.vector_store %arg15[%c0_101, %c0_102], %310 {strides = array<i32>} : memref<4x128xf32, #tpu.memory_space<vmem>>, vector<4x128xf32>,
    return
  }
  func.func @transform_0(%arg0: i32) -> (i32, i32) {
    %c0_i32 = arith.constant 0 : i32
    %c0_i32_0 = arith.constant 0 : i32
    return %c0_i32, %arg0 : i32, i32
  }
  func.func @transform_1(%arg0: i32) -> (i32, i32) {
    %c0_i32 = arith.constant 0 : i32
    %c0_i32_0 = arith.constant 0 : i32
    %c0_i32_1 = arith.constant 0 : i32
    return %c0_i32, %c0_i32_0 : i32, i32
  }
  func.func @transform_2(%arg0: i32) -> (i32, i32) {
    %c0_i32 = arith.constant 0 : i32
    %c0_i32_0 = arith.constant 0 : i32
    %c0_i32_1 = arith.constant 0 : i32
    return %c0_i32, %c0_i32_0 : i32, i32
  }
  func.func @transform_3(%arg0: i32) -> (i32, i32) {
    %c0_i32 = arith.constant 0 : i32
    %c0_i32_0 = arith.constant 0 : i32
    %c0_i32_1 = arith.constant 0 : i32
    return %c0_i32, %c0_i32_0 : i32, i32
  }
  func.func @transform_4(%arg0: i32) -> (i32, i32) {
    %c0_i32 = arith.constant 0 : i32
    %c0_i32_0 = arith.constant 0 : i32
    %c0_i32_1 = arith.constant 0 : i32
    return %c0_i32, %c0_i32_0 : i32, i32
  }
  func.func @transform_5(%arg0: i32) -> (i32, i32, i32) {
    %c0_i32 = arith.constant 0 : i32
    %c0_i32_0 = arith.constant 0 : i32
    %c0_i32_1 = arith.constant 0 : i32
    %c0_i32_2 = arith.constant 0 : i32
    return %c0_i32, %c0_i32_0, %c0_i32_1 : i32, i32, i32
  }
  func.func @transform_6(%arg0: i32) -> (i32, i32, i32) {
    %c0_i32 = arith.constant 0 : i32
    %c0_i32_0 = arith.constant 0 : i32
    %c0_i32_1 = arith.constant 0 : i32
    %c0_i32_2 = arith.constant 0 : i32
    return %c0_i32, %c0_i32_0, %c0_i32_1 : i32, i32, i32
  }
  func.func @transform_7(%arg0: i32) -> (i32, i32, i32) {
    %c0_i32 = arith.constant 0 : i32
    %c0_i32_0 = arith.constant 0 : i32
    %c0_i32_1 = arith.constant 0 : i32
    %c0_i32_2 = arith.constant 0 : i32
    return %c0_i32, %c0_i32_0, %c0_i32_1 : i32, i32, i32
  }
  func.func @transform_8(%arg0: i32) -> (i32, i32, i32) {
    %c0_i32 = arith.constant 0 : i32
    %c0_i32_0 = arith.constant 0 : i32
    %c0_i32_1 = arith.constant 0 : i32
    %c0_i32_2 = arith.constant 0 : i32
    return %c0_i32, %c0_i32_0, %c0_i32_1 : i32, i32, i32
  }
  func.func @transform_9(%arg0: i32) -> (i32, i32, i32) {
    %c0_i32 = arith.constant 0 : i32
    %c0_i32_0 = arith.constant 0 : i32
    %c0_i32_1 = arith.constant 0 : i32
    %c0_i32_2 = arith.constant 0 : i32
    return %c0_i32, %c0_i32_0, %c0_i32_1 : i32, i32, i32
  }
  func.func @transform_10(%arg0: i32) -> (i32, i32, i32) {
    %c0_i32 = arith.constant 0 : i32
    %c0_i32_0 = arith.constant 0 : i32
    %c0_i32_1 = arith.constant 0 : i32
    %c0_i32_2 = arith.constant 0 : i32
    return %c0_i32, %c0_i32_0, %c0_i32_1 : i32, i32, i32
  }
  func.func @transform_11(%arg0: i32) -> (i32, i32, i32) {
    %c0_i32 = arith.constant 0 : i32
    %c0_i32_0 = arith.constant 0 : i32
    %c0_i32_1 = arith.constant 0 : i32
    %c0_i32_2 = arith.constant 0 : i32
    return %c0_i32, %c0_i32_0, %c0_i32_1 : i32, i32, i32
  }
  func.func @transform_12(%arg0: i32) -> (i32, i32, i32) {
    %c0_i32 = arith.constant 0 : i32
    %c0_i32_0 = arith.constant 0 : i32
    %c0_i32_1 = arith.constant 0 : i32
    %c0_i32_2 = arith.constant 0 : i32
    return %c0_i32, %c0_i32_0, %c0_i32_1 : i32, i32, i32
  }
  func.func @transform_13(%arg0: i32) -> (i32, i32, i32) {
    %c0_i32 = arith.constant 0 : i32
    %c0_i32_0 = arith.constant 0 : i32
    %c0_i32_1 = arith.constant 0 : i32
    %c0_i32_2 = arith.constant 0 : i32
    return %c0_i32, %c0_i32_0, %c0_i32_1 : i32, i32, i32
  }
  func.func @transform_14(%arg0: i32) -> (i32, i32) {
    %c0_i32 = arith.constant 0 : i32
    %c0_i32_0 = arith.constant 0 : i32
    return %c0_i32, %arg0 : i32, i32
  }
}

</mosaic_0001>

<bundles_post_ra>
// kernel: tpu_custom_call.1
= control target key start
LH: loop header
LB: loop body
LE: loop exit
PB: predicated region body
PF: predicated region fallthrough
CT: control target
= control target key end

     0   :  { %vm254_vm0 = vcmask 1043456   ;;  %v2854_v3 = vmov 0   ;;  %vm247_vm1 = vcmask 64512   ;;  %s3576_s0 = inlined_call_operand.vmem [shape: f32[8,128], index: 0, kind: input, shape index: {}]   ;;  %s3577_s1 = inlined_call_operand.vmem [shape: bf16[32,8], index: 1, kind: input, shape index: {}]   ;;  %s3578_s2 = inlined_call_operand.vmem [shape: f32[32,1], index: 2, kind: input, shape index: {}]   ;;  %s3579_s3 = inlined_call_operand.vmem [shape: bf16[4,32], index: 3, kind: input, shape index: {}]   ;;  %s3580_s4 = inlined_call_operand.vmem [shape: f32[4,1], index: 4, kind: input, shape index: {}]   ;;  %s3581_s5 = inlined_call_operand.vmem [shape: f32[3,32,1], index: 5, kind: input, shape index: {}]   ;;  %s3582_s6 = inlined_call_operand.vmem [shape: bf16[3,64,32], index: 6, kind: input, shape index: {}]   ;;  %s3583_s7 = inlined_call_operand.vmem [shape: f32[3,64,1], index: 7, kind: input, shape index: {}]   ;;  %s3584_s8 = inlined_call_operand.vmem [shape: bf16[3,32,32], index: 8, kind: input, shape index: {}]   ;;  %s3585_s9 = inlined_call_operand.vmem [shape: f32[3,32,1], index: 9, kind: input, shape index: {}]   ;;  %s3586_s10 = inlined_call_operand.vmem [shape: bf16[3,64,32], index: 10, kind: input, shape index: {}]   ;;  %s3587_s11 = inlined_call_operand.vmem [shape: f32[3,64,1], index: 11, kind: input, shape index: {}]   ;;  %s3588_s12 = inlined_call_operand.vmem [shape: bf16[3,32,32], index: 12, kind: input, shape index: {}]   ;;  %s3589_s13 = inlined_call_operand.vmem [shape: f32[3,32,1], index: 13, kind: input, shape index: {}]   ;;  %s3590_s14 = inlined_call_operand.hbm [shape: f32[4,128], index: 14, kind: output, shape index: {}]  }
   0x1   :  { %v56_v0 = vld [vmem:[%s3578_s2 + $0x10] sm:$0xff]  ;;  %v54_v1 = vld [vmem:[%s3578_s2] sm:$0xff]  ;;  %2595 = vset.pattern.permute.xlu1 %v2854_v3  ;;  %2594 = vset.pattern.permute.xlu0 %v2854_v3  ;;  %v57_v5 = vld [vmem:[%s3578_s2 + $0x18] sm:$0xff] }
   0x2   :  { %v49_v2 = vld [vmem:[%s3576_s0] sm:$0xff]  ;;  %229 = vperm.xlu1 %2595, %v56_v0   ;;  %219 = vperm.xlu0 %2594, %v54_v1   ;;  %v55_v8 = vld [vmem:[%s3578_s2 + $0x8] sm:$0xff]  ;;  %v63_v10 = vld [vmem:[%s3581_s5 + $0x18] sm:$0xff] }
   0x3   :  { %v216_v4 = vpack.c.bf16 %v49_v2, %v49_v2  ;;  %v2596_v6 = vld [vmem:[%s3577_s1] sm:$0xff]   ;;  %v2597_v9 = vld [vmem:[%s3577_s1 + $0x8] sm:$0xff]   ;;  %v62_v11 = vld [vmem:[%s3581_s5 + $0x10] sm:$0xff] }
   0x4   :  { %2457 = vmatprep.mubr.msk.bf16.mxu0 %vm247_vm1, %v2596_v6  ;;  %v61_v12 = vld [vmem:[%s3581_s5 + $0x8] sm:$0xff]  ;;  %v60_v13 = vld [vmem:[%s3581_s5] sm:$0xff]  ;;  %v99_v14 = vld [vmem:[%s3583_s7 + $0x18] sm:$0xff] }
   0x5   :  { %2589 = vmatprep.subr.msk.bf16.mxu0 %vm254_vm0, %v216_v4  ;;  %v256_v7 = vsel %vm254_vm0, %v216_v4, 0  ;;  %v98_v15 = vld [vmem:[%s3583_s7 + $0x10] sm:$0xff]  ;;  %v97_v16 = vld [vmem:[%s3583_s7 + $0x8] sm:$0xff]  ;;  %v96_v17 = vld [vmem:[%s3583_s7] sm:$0xff] }
   0x6   :  { %2456 = vmatpush3.bf16.msra.mxu0 %v256_v7  ;;  %234 = vperm.xlu1 %2595, %v57_v5   ;;  %v135_v18 = vld [vmem:[%s3585_s9 + $0x18] sm:$0xff]  ;;  %v134_v19 = vld [vmem:[%s3585_s9 + $0x10] sm:$0xff]  ;;  %v133_v20 = vld [vmem:[%s3585_s9 + $0x8] sm:$0xff] }
   0x7   :  { %224 = vperm.xlu0 %2594, %v55_v8   ;;  %v132_v21 = vld [vmem:[%s3585_s9] sm:$0xff]  ;;  %v171_v22 = vld [vmem:[%s3587_s11 + $0x18] sm:$0xff]  ;;  %v170_v23 = vld [vmem:[%s3587_s11 + $0x10] sm:$0xff] }
   0x8   :  { %v169_v24 = vld [vmem:[%s3587_s11 + $0x8] sm:$0xff]  ;;  %v168_v25 = vld [vmem:[%s3587_s11] sm:$0xff]  ;;  %v175_v28 = vld [vmem:[%s3587_s11 + $0x38] sm:$0xff] }
   0x9   :  { %2458 = vmatmul.mubr.msk.bf16.vlgmr.msra.gmra.mxu0 %vm247_vm1, %v2597_v9  ;;  %v173_v26 = vld [vmem:[%s3587_s11 + $0x28] sm:$0xff]  ;;  %v172_v27 = vld [vmem:[%s3587_s11 + $0x20] sm:$0xff]  ;;  %v174_v29 = vld [vmem:[%s3587_s11 + $0x30] sm:$0xff] }
   0xa   :  { %357 = vperm.xlu1 %2595, %v63_v10   ;;  %v103_v30 = vld [vmem:[%s3583_s7 + $0x38] sm:$0xff]  ;;  %v102_v31 = vld [vmem:[%s3583_s7 + $0x30] sm:$0xff]  ;;  %v101_v32 = vld [vmem:[%s3583_s7 + $0x28] sm:$0xff] }
   0xb   :  { %352 = vperm.xlu0 %2594, %v62_v11   ;;  %v100_v33 = vld [vmem:[%s3583_s7 + $0x20] sm:$0xff]  ;;  %v205_v34 = vld [vmem:[%s3589_s13 + $0x8] sm:$0xff] }
   0xc   :  { %v204_v35 = vld [vmem:[%s3589_s13] sm:$0xff] }
   0xe   :  { %347 = vperm.xlu1 %2595, %v61_v12  }
   0xf   :  { %342 = vperm.xlu0 %2594, %v60_v13  }
  0x12   :  { %383 = vperm.xlu1 %2595, %v99_v14  }
  0x13   :  { %378 = vperm.xlu0 %2594, %v98_v15  }
  0x16   :  { %373 = vperm.xlu1 %2595, %v97_v16  }
  0x17   :  { %368 = vperm.xlu0 %2594, %v96_v17  }
  0x1a   :  { %551 = vperm.xlu1 %2595, %v135_v18  }
  0x1b   :  { %546 = vperm.xlu0 %2594, %v134_v19  }
  0x1e   :  { %541 = vperm.xlu1 %2595, %v133_v20  }
  0x1f   :  { %536 = vperm.xlu0 %2594, %v132_v21  }
  0x22   :  { %638 = vperm.xlu1 %2595, %v171_v22  }
  0x23   :  { %633 = vperm.xlu0 %2594, %v170_v23  }
  0x26   :  { %628 = vperm.xlu1 %2595, %v169_v24  }
  0x27   :  { %623 = vperm.xlu0 %2594, %v168_v25  }
  0x2a   :  { %648 = vperm.xlu1 %2595, %v173_v26  }
  0x2b   :  { %643 = vperm.xlu0 %2594, %v172_v27  }
  0x2e   :  { %658 = vperm.xlu1 %2595, %v175_v28  }
  0x2f   :  { %653 = vperm.xlu0 %2594, %v174_v29  }
  0x32   :  { %403 = vperm.xlu1 %2595, %v103_v30  }
  0x33   :  { %398 = vperm.xlu0 %2594, %v102_v31  }
  0x36   :  { %393 = vperm.xlu1 %2595, %v101_v32  }
  0x37   :  { %388 = vperm.xlu0 %2594, %v100_v33  }
  0x38   :  { %19 = vsyncpa [#allocation3], 0  ;;  %v207_v36 = vld [vmem:[%s3589_s13 + $0x18] sm:$0xff]  ;;  %v206_v37 = vld [vmem:[%s3589_s13 + $0x10] sm:$0xff]  ;;  %vm426_vm2 = vcmask 261120   ;;  %vm2856_vm7 = vmmov 0  }
  0x39   :  { %v67_v38 = vld [vmem:[%s3581_s5 + $0x38] sm:$0xff]  ;;  %v66_v39 = vld [vmem:[%s3581_s5 + $0x30] sm:$0xff]  ;;  %v65_v40 = vld [vmem:[%s3581_s5 + $0x28] sm:$0xff]  ;;  %s2857_s17 = smov [#allocation2]  }
  0x3a   :  { %880 = vperm.xlu1 %2595, %v205_v34   ;;  %v64_v41 = vld [vmem:[%s3581_s5 + $0x20] sm:$0xff]  ;;  %v107_v42 = vld [vmem:[%s3583_s7 + $0x58] sm:$0xff]  ;;  %v106_v43 = vld [vmem:[%s3583_s7 + $0x50] sm:$0xff]  ;;  %s2304_s18 = sshll.u32 %s2857_s17, 4  ;;  %s2305_s18 = int_to_ptr.vmem [resolvable:$true] %s2304_s18 }
  0x3b   :  { %875 = vperm.xlu0 %2594, %v204_v35   ;;  %v105_v44 = vld [vmem:[%s3583_s7 + $0x48] sm:$0xff]  ;;  %v104_v45 = vld [vmem:[%s3583_s7 + $0x40] sm:$0xff]  ;;  %v139_v46 = vld [vmem:[%s3585_s9 + $0x38] sm:$0xff]  ;;  %s2832_s19 = scalar_lea.vmem %s2305_s18, 64  ;;  %p2837_p1 = scmp.lt.s32.totalorder %s2305_s18, %s2305_s18 }
  0x3c   :  { %v138_v47 = vld [vmem:[%s3585_s9 + $0x30] sm:$0xff]  ;;  %v137_v48 = vld [vmem:[%s3585_s9 + $0x28] sm:$0xff]  ;;  %v136_v49 = vld [vmem:[%s3585_s9 + $0x20] sm:$0xff]  ;;  %p2833_p0 = scmp.ne.s32.totalorder %s2305_s18, %s2832_s19  ;;  %p2838_p2 = scmp.lt.s32.totalorder %s2832_s19, %s2832_s19 }
  0x3d   :  { %v179_v50 = vld [vmem:[%s3587_s11 + $0x58] sm:$0xff]  ;;  %v178_v51 = vld [vmem:[%s3587_s11 + $0x50] sm:$0xff]  ;;  %v177_v52 = vld [vmem:[%s3587_s11 + $0x48] sm:$0xff] }
  0x3e   :  { %890 = vperm.xlu1 %2595, %v207_v36   ;;  %v176_v53 = vld [vmem:[%s3587_s11 + $0x40] sm:$0xff]  ;;  %v181_v54 = vld [vmem:[%s3587_s11 + $0x68] sm:$0xff]  ;;  %v183_v56 = vld [vmem:[%s3587_s11 + $0x78] sm:$0xff]  ;;  %p2839_p3 = por %p2838_p2, %p2837_p1 }
  0x3f   :  { %885 = vperm.xlu0 %2594, %v206_v37   ;;  %v180_v55 = vld [vmem:[%s3587_s11 + $0x60] sm:$0xff]  ;;  %v182_v57 = vld [vmem:[%s3587_s11 + $0x70] sm:$0xff]  ;;  %v111_v58 = vld [vmem:[%s3583_s7 + $0x78] sm:$0xff] }
  0x40   :  { %v110_v59 = vld [vmem:[%s3583_s7 + $0x70] sm:$0xff]  ;;  %v109_v60 = vld [vmem:[%s3583_s7 + $0x68] sm:$0xff]  ;;  %v108_v61 = vld [vmem:[%s3583_s7 + $0x60] sm:$0xff]  ;;  %p2840_p4 = pnand %p2839_p3, %p2833_p0 }
  0x41   :  { %v209_v62 = vld [vmem:[%s3589_s13 + $0x28] sm:$0xff]  ;;  %v208_v63 = vld [vmem:[%s3589_s13 + $0x20] sm:$0xff]  ;;  %v211_v0 = vld [vmem:[%s3589_s13 + $0x38] sm:$0xff] }
  0x42   :  { %999 = vperm.xlu1 %2595, %v67_v38   ;;  %v210_v1 = vld [vmem:[%s3589_s13 + $0x30] sm:$0xff]  ;;  %v71_v2 = vld [vmem:[%s3581_s5 + $0x58] sm:$0xff]  ;;  %v69_v4 = vld [vmem:[%s3581_s5 + $0x48] sm:$0xff] }
  0x43   :  { %994 = vperm.xlu0 %2594, %v66_v39   ;;  %v70_v3 = vld [vmem:[%s3581_s5 + $0x50] sm:$0xff]  ;;  %v68_v5 = vld [vmem:[%s3581_s5 + $0x40] sm:$0xff]  ;;  %v115_v6 = vld [vmem:[%s3583_s7 + $0x98] sm:$0xff] }
  0x44   :  { %v114_v7 = vld [vmem:[%s3583_s7 + $0x90] sm:$0xff]  ;;  %v113_v8 = vld [vmem:[%s3583_s7 + $0x88] sm:$0xff]  ;;  %v112_v9 = vld [vmem:[%s3583_s7 + $0x80] sm:$0xff] }
  0x45   :  { %v2598_v10 = vld [vmem:[%s3582_s6] sm:$0xff]   ;;  %v143_v11 = vld [vmem:[%s3585_s9 + $0x58] sm:$0xff]  ;;  %v142_v12 = vld [vmem:[%s3585_s9 + $0x50] sm:$0xff] }
  0x46   :  { %989 = vperm.xlu1 %2595, %v65_v40   ;;  %2465 = vmatprep.mubr.msk.bf16.mxu1 %vm426_vm2, %v2598_v10  ;;  %v141_v13 = vld [vmem:[%s3585_s9 + $0x48] sm:$0xff]  ;;  %v140_v14 = vld [vmem:[%s3585_s9 + $0x40] sm:$0xff]  ;;  %v187_v15 = vld [vmem:[%s3587_s11 + $0x98] sm:$0xff] }
  0x47   :  { %984 = vperm.xlu0 %2594, %v64_v41   ;;  %v186_v16 = vld [vmem:[%s3587_s11 + $0x90] sm:$0xff]  ;;  %v185_v17 = vld [vmem:[%s3587_s11 + $0x88] sm:$0xff]  ;;  %v184_v18 = vld [vmem:[%s3587_s11 + $0x80] sm:$0xff] }
  0x48   :  { %v189_v19 = vld [vmem:[%s3587_s11 + $0xa8] sm:$0xff]  ;;  %v188_v20 = vld [vmem:[%s3587_s11 + $0xa0] sm:$0xff]  ;;  %v191_v21 = vld [vmem:[%s3587_s11 + $0xb8] sm:$0xff] }
  0x49   :  { %v190_v22 = vld [vmem:[%s3587_s11 + $0xb0] sm:$0xff]  ;;  %v119_v23 = vld [vmem:[%s3583_s7 + $0xb8] sm:$0xff]  ;;  %v117_v25 = vld [vmem:[%s3583_s7 + $0xa8] sm:$0xff] }
  0x4a   :  { %1025 = vperm.xlu1 %2595, %v107_v42   ;;  %v118_v24 = vld [vmem:[%s3583_s7 + $0xb0] sm:$0xff]  ;;  %v116_v26 = vld [vmem:[%s3583_s7 + $0xa0] sm:$0xff]  ;;  %v215_v27 = vld [vmem:[%s3589_s13 + $0x58] sm:$0xff] }
  0x4b   :  { %1020 = vperm.xlu0 %2594, %v106_v43   ;;  %v214_v28 = vld [vmem:[%s3589_s13 + $0x50] sm:$0xff]  ;;  %v213_v29 = vld [vmem:[%s3589_s13 + $0x48] sm:$0xff]  ;;  %v212_v30 = vld [vmem:[%s3589_s13 + $0x40] sm:$0xff] }
  0x4c   :  { %v59_v31 = vld [vmem:[%s3580_s4] sm:$0xf] }
  0x4e   :  { %1015 = vperm.xlu1 %2595, %v105_v44  }
  0x4f   :  { %1010 = vperm.xlu0 %2594, %v104_v45  }
  0x52   :  { %1192 = vperm.xlu1 %2595, %v139_v46  }
  0x53   :  { %1187 = vperm.xlu0 %2594, %v138_v47  }
  0x56   :  { %1182 = vperm.xlu1 %2595, %v137_v48  }
  0x57   :  { %1177 = vperm.xlu0 %2594, %v136_v49  }
  0x5a   :  { %1279 = vperm.xlu1 %2595, %v179_v50  }
  0x5b   :  { %1274 = vperm.xlu0 %2594, %v178_v51  }
  0x5e   :  { %1269 = vperm.xlu1 %2595, %v177_v52  }
  0x5f   :  { %1264 = vperm.xlu0 %2594, %v176_v53  }
  0x62   :  { %1289 = vperm.xlu1 %2595, %v181_v54  }
  0x63   :  { %1284 = vperm.xlu0 %2594, %v180_v55  }
  0x66   :  { %1299 = vperm.xlu1 %2595, %v183_v56  }
  0x67   :  { %1294 = vperm.xlu0 %2594, %v182_v57  }
  0x6a   :  { %1045 = vperm.xlu1 %2595, %v111_v58  }
  0x6b   :  { %1040 = vperm.xlu0 %2594, %v110_v59  }
  0x6e   :  { %1035 = vperm.xlu1 %2595, %v109_v60  }
  0x6f   :  { %1030 = vperm.xlu0 %2594, %v108_v61  }
  0x72   :  { %1521 = vperm.xlu1 %2595, %v209_v62  }
  0x73   :  { %1516 = vperm.xlu0 %2594, %v208_v63  }
  0x76   :  { %1531 = vperm.xlu1 %2595, %v211_v0  }
  0x77   :  { %1526 = vperm.xlu0 %2594, %v210_v1  }
  0x7a   :  { %1640 = vperm.xlu1 %2595, %v71_v2  }
  0x7b   :  { %1635 = vperm.xlu0 %2594, %v70_v3  }
  0x7d   :  { %v230_v32 = vpop.permute.xlu1 %229  ;;  %v220_v34 = vpop.permute.xlu0 %219 }
  0x7e   :  { %1630 = vperm.xlu1 %2595, %v69_v4  }
  0x7f   :  { %1625 = vperm.xlu0 %2594, %v68_v5  }
  0x81   :  { %v235_v38 = vpop.permute.xlu1 %234 }
  0x82   :  { %1666 = vperm.xlu1 %2595, %v115_v6   ;;  %v225_v42 = vpop.permute.xlu0 %224 }
  0x83   :  { %1661 = vperm.xlu0 %2594, %v114_v7  }
  0x85   :  { %v358_v3 = vpop.permute.xlu1 %357 }
  0x86   :  { %1656 = vperm.xlu1 %2595, %v113_v8   ;;  %v353_v4 = vpop.permute.xlu0 %352 }
  0x87   :  { %1651 = vperm.xlu0 %2594, %v112_v9  }
  0x89   :  { %v348_v10 = vpop.permute.xlu1 %347 }
  0x8a   :  { %1833 = vperm.xlu1 %2595, %v143_v11   ;;  %v343_v11 = vpop.permute.xlu0 %342 }
  0x8b   :  { %1828 = vperm.xlu0 %2594, %v142_v12  }
  0x8e   :  { %1823 = vperm.xlu1 %2595, %v141_v13  }
  0x8f   :  { %1818 = vperm.xlu0 %2594, %v140_v14  }
  0x92   :  { %1920 = vperm.xlu1 %2595, %v187_v15  }
  0x93   :  { %1915 = vperm.xlu0 %2594, %v186_v16  }
  0x96   :  { %1910 = vperm.xlu1 %2595, %v185_v17  }
  0x97   :  { %1905 = vperm.xlu0 %2594, %v184_v18   ;;  %v2599_v18 = vld [vmem:[%s3582_s6 + $0x8] sm:$0xff]  }
  0x9a   :  { %1930 = vperm.xlu1 %2595, %v189_v19   ;;  %v2600_v19 = vld [vmem:[%s3582_s6 + $0x10] sm:$0xff]  }
  0x9b   :  { %1925 = vperm.xlu0 %2594, %v188_v20   ;;  %v2601_v20 = vld [vmem:[%s3582_s6 + $0x18] sm:$0xff]  }
  0x9e   :  { %1940 = vperm.xlu1 %2595, %v191_v21   ;;  %v2602_v21 = vld [vmem:[%s3584_s8] sm:$0xff]  }
  0x9f   :  { %1935 = vperm.xlu0 %2594, %v190_v22   ;;  %2477 = vmatprep.mubr.msk.bf16.mxu0 %vm426_vm2, %v2602_v21  ;;  %v379_v22 = vpop.permute.xlu0 %378 }
  0xa2   :  { %1686 = vperm.xlu1 %2595, %v119_v23   ;;  %v384_v23 = vpop.permute.xlu1 %383 }
  0xa3   :  { %1681 = vperm.xlu0 %2594, %v118_v24  }
  0xa6   :  { %1676 = vperm.xlu1 %2595, %v117_v25  }
  0xa7   :  { %1671 = vperm.xlu0 %2594, %v116_v26   ;;  %v369_v26 = vpop.permute.xlu0 %368 }
  0xaa   :  { %2172 = vperm.xlu1 %2595, %v215_v27  }
  0xab   :  { %2167 = vperm.xlu0 %2594, %v214_v28  }
  0xae   :  { %2162 = vperm.xlu1 %2595, %v213_v29  }
  0xaf   :  { %2157 = vperm.xlu0 %2594, %v212_v30  }
  0xb3   :  { %2248 = vperm.xlu0 %2594, %v59_v31  }
  0xc9   :  { %v2459_v33 = vpop.f32.mrf.mxu0 }
  0xca   :  { %v301_v36 = vadd.f32 %v2459_v33, %v230_v32 }
  0xcb   :  { %v292_v35 = vpop.f32.mrf.mxu0 }
  0xcc   :  { %v293_v37 = vadd.f32 %v292_v35, %v220_v34  ;;  %v313_v44 = vmul.f32 0.01, %v301_v36  ;;  %vm309_vm4 = vcmp.ge.f32.partialorder %v301_v36, 0.0  ;;  %v374_v34 = vpop.permute.xlu1 %373 }
  0xcd   :  { %v2460_v39 = vpop.f32.mrf.mxu0 }
  0xce   :  { %v311_v40 = vmul.f32 0.01, %v293_v37  ;;  %v304_v41 = vadd.f32 %v2460_v39, %v235_v38  ;;  %vm307_vm3 = vcmp.ge.f32.partialorder %v293_v37, 0.0  ;;  %v3215_v49 = vsel %vm309_vm4, %v301_v36, %v313_v44 }
  0xcf   :  { %v295_v43 = vpop.f32.mrf.mxu0  ;;  %v321_v54 = vmul.f32 %v3215_v49, %v3215_v49 }
  0xd0   :  { %v296_v45 = vadd.f32 %v295_v43, %v225_v42  ;;  %v3213_v46 = vsel %vm307_vm3, %v293_v37, %v311_v40  ;;  %v314_v47 = vmul.f32 0.01, %v304_v41  ;;  %vm310_vm6 = vcmp.ge.f32.partialorder %v304_v41, 0.0 }
  0xd1   :  { %v319_v51 = vmul.f32 %v3213_v46, %v3213_v46 }
  0xd2   :  { %vm308_vm5 = vcmp.ge.f32.partialorder %v296_v45, 0.0  ;;  %v312_v48 = vmul.f32 0.01, %v296_v45  ;;  %v3223_v53 = vsel %vm310_vm6, %v304_v41, %v314_v47 }
  0xd3   :  { %v322_v56 = vmul.f32 %v3223_v53, %v3223_v53 }
  0xd4   :  { %v3217_v50 = vsel %vm308_vm5, %v296_v45, %v312_v48 }
  0xd5   :  { %v320_v52 = vmul.f32 %v3217_v50, %v3217_v50 }
  0xd7   :  { %v323_v55 = vadd.f32 %v320_v52, %v319_v51 }
  0xd9   :  { %v324_v57 = vadd.f32 %v323_v55, %v321_v54 }
  0xdb   :  { %v325_v58 = vadd.f32 %v324_v57, %v322_v56 }
  0xdd   :  { %v326_v59 = vrot.slane %v325_v58, 4 }
  0xdf   :  { %v327_v60 = vadd.f32 %v326_v59, %v325_v58 }
  0xe1   :  { %v328_v61 = vrot.slane %v327_v60, 2 }
  0xe3   :  { %v329_v62 = vadd.f32 %v328_v61, %v327_v60 }
  0xe5   :  { %v330_v63 = vrot.slane %v329_v62, 1 }
  0xe7   :  { %v331_v0 = vadd.f32 %v330_v63, %v329_v62 }
  0xe9   :  { %v333_v1 = vmul.f32 0.03125, %v331_v0  ;;  %v2603_v0 = vld [vmem:[%s3584_s8 + $0x8] sm:$0xff]  }
  0xeb   :  { %v334_v2 = vadd.f32 1e-05, %v333_v1  ;;  %v2604_v1 = vld [vmem:[%s3586_s10] sm:$0xff]  }
  0xed   :  { %2634 = vrsqrt.f32 %v334_v2  ;;  %v552_v2 = vpop.permute.xlu1 %551 }
  0xfa   :  { %v2635_v5 = vpop.eup %2634 }
  0xfb   :  { %v337_v6 = vmul.f32 %v2635_v5, %v3217_v50  ;;  %v338_v7 = vmul.f32 %v2635_v5, %v3215_v49  ;;  %v339_v8 = vmul.f32 %v2635_v5, %v3223_v53  ;;  %v336_v9 = vmul.f32 %v2635_v5, %v3213_v46 }
  0xfd   :  { %v362_v12 = vmul.f32 %v353_v4, %v338_v7  ;;  %v363_v13 = vmul.f32 %v358_v3, %v339_v8  ;;  %v360_v14 = vmul.f32 %v343_v11, %v336_v9  ;;  %v361_v15 = vmul.f32 %v348_v10, %v337_v6  ;;  %v547_v3 = vpop.permute.xlu0 %546  ;;  %v542_v7 = vpop.permute.xlu1 %541 }
  0xff   :  { %v365_v16 = vpack.c.bf16 %v363_v13, %v362_v12  ;;  %v364_v17 = vpack.c.bf16 %v361_v15, %v360_v14 }
 0x101   :  { %2461 = vmatprep.subr.bf16.mxu1 %v365_v16  ;;  %v537_v10 = vpop.permute.xlu0 %536 }
 0x102   :  { %2462 = vmatpush3.bf16.msra.mxu1 %v365_v16  ;;  %v2605_v16 = vld [vmem:[%s3586_s10 + $0x8] sm:$0xff]  }
 0x103   :  { %2463 = vmatprep.subr.bf16.mxu1 %v364_v17 }
 0x105   :  { %v634_v21 = vpop.permute.xlu0 %633 }
 0x106   :  { %2464 = vmatpush3.bf16.msra.mxu1 %v364_v17  ;;  %v2606_v17 = vld [vmem:[%s3586_s10 + $0x10] sm:$0xff]  }
 0x109   :  { %2466 = vmatmul.mubr.msk.bf16.vlgmr.msra.gmra.mxu1 %vm426_vm2, %v2599_v18  ;;  %v2607_v18 = vld [vmem:[%s3586_s10 + $0x18] sm:$0xff]  }
 0x10a   :  { %2469 = vmatprep.mubr.msk.bf16.mxu1 %vm426_vm2, %v2600_v19  ;;  %v2608_v19 = vld [vmem:[%s3588_s12] sm:$0xff]  }
 0x111   :  { %2470 = vmatmul.mubr.msk.bf16.gmra.mxu1 %vm426_vm2, %v2601_v20  ;;  %v639_v20 = vpop.permute.xlu1 %638 }
 0x112   :  { %2497 = vmatprep.mubr.msk.bf16.mxu1 %vm426_vm2, %v2608_v19 }
 0x1c9   :  { %v2467_v24 = vpop.f32.mrf.mxu1 }
 0x1ca   :  { %v482_v25 = vadd.f32 %v2467_v24, %v379_v22 }
 0x1cb   :  { %v473_v27 = vpop.f32.mrf.mxu1 }
 0x1cc   :  { %v506_v28 = vsub.f32 0.0, %v482_v25  ;;  %v474_v29 = vadd.f32 %v473_v27, %v369_v26 }
 0x1cd   :  { %v2468_v30 = vpop.f32.mrf.mxu1 }
 0x1ce   :  { %v512_v31 = vmul.f32 1.442695, %v506_v28  ;;  %v504_v32 = vsub.f32 0.0, %v474_v29  ;;  %v485_v33 = vadd.f32 %v2468_v30, %v384_v23  ;;  %v629_v23 = vpop.permute.xlu1 %628 }
 0x1cf   :  { %v476_v35 = vpop.f32.mrf.mxu1 }
 0x1d0   :  { %2636 = vpow2.f32 %v512_v31  ;;  %v508_v36 = vmul.f32 1.442695, %v504_v32  ;;  %v507_v37 = vsub.f32 0.0, %v485_v33  ;;  %v477_v38 = vadd.f32 %v476_v35, %v374_v34 }
 0x1d2   :  { %2638 = vpow2.f32 %v508_v36  ;;  %v514_v39 = vmul.f32 1.442695, %v507_v37  ;;  %v505_v40 = vsub.f32 0.0, %v477_v38  ;;  %v649_v34 = vpop.permute.xlu1 %648 }
 0x1d4   :  { %2640 = vpow2.f32 %v514_v39  ;;  %v510_v41 = vmul.f32 1.442695, %v505_v40 }
 0x1d6   :  { %2642 = vpow2.f32 %v510_v41 }
 0x1dd   :  { %v2637_v42 = vpop.eup %2636 }
 0x1de   :  { %v518_v43 = vadd.f32 1.0, %v2637_v42 }
 0x1df   :  { %v2639_v44 = vpop.eup %2638 }
 0x1e0   :  { %v516_v45 = vadd.f32 1.0, %v2639_v44  ;;  %2644 = vrcp.f32 %v518_v43 }
 0x1e1   :  { %v2641_v47 = vpop.eup %2640 }
 0x1e2   :  { %v519_v48 = vadd.f32 1.0, %v2641_v47  ;;  %2646 = vrcp.f32 %v516_v45 }
 0x1e3   :  { %v2643_v51 = vpop.eup %2642 }
 0x1e4   :  { %2648 = vrcp.f32 %v519_v48  ;;  %v517_v52 = vadd.f32 1.0, %v2643_v51  ;;  %v659_v51 = vpop.permute.xlu1 %658 }
 0x1e6   :  { %2650 = vrcp.f32 %v517_v52 }
 0x1ed   :  { %v2645_v54 = vpop.eup %2644 }
 0x1ee   :  { %v530_v57 = vmul.f32 %v2645_v54, %v482_v25  ;;  %v624_v25 = vpop.permute.xlu0 %623 }
 0x1ef   :  { %v2647_v55 = vpop.eup %2646 }
 0x1f0   :  { %v528_v60 = vmul.f32 %v2647_v55, %v474_v29 }
 0x1f1   :  { %v2649_v56 = vpop.eup %2648 }
 0x1f2   :  { %v531_v58 = vmul.f32 %v2649_v56, %v485_v33 }
 0x1f3   :  { %v2651_v59 = vpop.eup %2650 }
 0x1f4   :  { %v529_v61 = vmul.f32 %v2651_v59, %v477_v38  ;;  %v533_v62 = vpack.c.bf16 %v531_v58, %v530_v57  ;;  %v644_v38 = vpop.permute.xlu0 %643 }
 0x1f6   :  { %2473 = vmatprep.subr.bf16.mxu0 %v533_v62  ;;  %v532_v63 = vpack.c.bf16 %v529_v61, %v528_v60 }
 0x1f7   :  { %2474 = vmatpush3.bf16.msra.mxu0 %v533_v62 }
 0x1f8   :  { %2475 = vmatprep.subr.bf16.mxu0 %v532_v63  ;;  %v654_v54 = vpop.permute.xlu0 %653 }
 0x1fb   :  { %2476 = vmatpush3.bf16.msra.mxu0 %v532_v63 }
 0x1fe   :  { %2478 = vmatmul.mubr.msk.bf16.vlgmr.msra.gmra.mxu0 %vm426_vm2, %v2603_v0 }
 0x1ff   :  { %2485 = vmatprep.mubr.msk.bf16.mxu0 %vm426_vm2, %v2604_v1 }
 0x2be   :  { %v2479_v4 = vpop.f32.mrf.mxu0 }
 0x2bf   :  { %v3257_v8 = vadd.f32 %v2479_v4, %v547_v3  ;;  %v2471_v3 = vpop.f32.mrf.mxu1 }
 0x2c0   :  { %v604_v5 = vpop.f32.mrf.mxu0 }
 0x2c1   :  { %v3261_v12 = vadd.f32 %v604_v5, %v537_v10 }
 0x2c2   :  { %v2480_v6 = vpop.f32.mrf.mxu0 }
 0x2c3   :  { %v3259_v9 = vadd.f32 %v2480_v6, %v552_v2 }
 0x2c4   :  { %v607_v11 = vpop.f32.mrf.mxu0 }
 0x2c5   :  { %v620_v13 = vpack.c.bf16 %v3259_v9, %v3257_v8  ;;  %v3265_v14 = vadd.f32 %v607_v11, %v542_v7  ;;  %v399_v11 = vpop.permute.xlu0 %398 }
 0x2c6   :  { %v3297_v19 = vadd.f32 %v2471_v3, %v399_v11 }
 0x2c7   :  { %v619_v15 = vpack.c.bf16 %v3265_v14, %v3261_v12  ;;  %2481 = vmatprep.subr.bf16.mxu0 %v620_v13 }
 0x2c8   :  { %2482 = vmatpush3.bf16.msra.mxu0 %v620_v13  ;;  %v489_v13 = vpop.f32.mrf.mxu1 }
 0x2c9   :  { %2483 = vmatprep.subr.bf16.mxu0 %v619_v15 }
 0x2cc   :  { %2484 = vmatpush3.bf16.msra.mxu0 %v619_v15 }
 0x2cf   :  { %2486 = vmatmul.mubr.msk.bf16.vlgmr.msra.gmra.mxu0 %vm426_vm2, %v2605_v16 }
 0x2d0   :  { %2489 = vmatprep.mubr.msk.bf16.mxu0 %vm426_vm2, %v2606_v17  ;;  %v404_v17 = vpop.permute.xlu1 %403 }
 0x2d7   :  { %2490 = vmatmul.mubr.msk.bf16.gmra.mxu0 %vm426_vm2, %v2607_v18  ;;  %v2472_v18 = vpop.f32.mrf.mxu1 }
 0x38f   :  { %v2487_v22 = vpop.f32.mrf.mxu0 }
 0x390   :  { %v3285_v24 = vadd.f32 %v2487_v22, %v634_v21 }
 0x391   :  { %v727_v26 = vpop.f32.mrf.mxu0 }
 0x392   :  { %v764_v27 = vand.u32 2147483647, %v3285_v24  ;;  %v3288_v28 = vadd.f32 %v727_v26, %v624_v25  ;;  %v492_v25 = vpop.f32.mrf.mxu1 }
 0x393   :  { %v2488_v29 = vpop.f32.mrf.mxu0 }
 0x394   :  { %v768_v30 = vsub.f32 0.0, %v764_v27  ;;  %v762_v31 = vand.u32 2147483647, %v3288_v28  ;;  %v3291_v32 = vadd.f32 %v2488_v29, %v639_v20  ;;  %v389_v20 = vpop.permute.xlu0 %388  ;;  %v841_v27 = vsub.f32 0.0, %v3297_v19  ;;  %v394_v29 = vpop.permute.xlu1 %393 }
 0x395   :  { %v730_v33 = vpop.f32.mrf.mxu0  ;;  %v3299_v22 = vadd.f32 %v489_v13, %v389_v20 }
 0x396   :  { %v774_v35 = vmul.f32 1.442695, %v768_v30  ;;  %v766_v36 = vsub.f32 0.0, %v762_v31  ;;  %v765_v37 = vand.u32 2147483647, %v3291_v32  ;;  %v3294_v39 = vadd.f32 %v730_v33, %v629_v23 }
 0x397   :  { %v2491_v40 = vpop.f32.mrf.mxu0  ;;  %v3301_v23 = vadd.f32 %v2472_v18, %v404_v17  ;;  %v760_v30 = vmax.f32 %v3285_v24, 0.0 }
 0x398   :  { %2652 = vpow2.f32 %v774_v35  ;;  %v770_v41 = vmul.f32 1.442695, %v766_v36  ;;  %v769_v42 = vsub.f32 0.0, %v765_v37  ;;  %v763_v43 = vand.u32 2147483647, %v3294_v39 }
 0x399   :  { %v743_v44 = vpop.f32.mrf.mxu0  ;;  %v752_v57 = vadd.f32 %v2491_v40, %v654_v54  ;;  %v839_v35 = vsub.f32 0.0, %v3299_v22  ;;  %v3306_v36 = vadd.f32 %v492_v25, %v394_v29  ;;  %v842_v37 = vsub.f32 0.0, %v3301_v23 }
 0x39a   :  { %2654 = vpow2.f32 %v770_v41  ;;  %v776_v45 = vmul.f32 1.442695, %v769_v42  ;;  %v767_v47 = vsub.f32 0.0, %v763_v43  ;;  %v744_v52 = vadd.f32 %v743_v44, %v644_v38 }
 0x39b   :  { %v2492_v48 = vpop.f32.mrf.mxu0  ;;  %v758_v40 = vmax.f32 %v3288_v28, 0.0  ;;  %v847_v43 = vmul.f32 1.442695, %v841_v27  ;;  %v761_v44 = vmax.f32 %v3291_v32, 0.0  ;;  %v759_v28 = vmax.f32 %v3294_v39, 0.0 }
 0x39c   :  { %2656 = vpow2.f32 %v776_v45  ;;  %v772_v55 = vmul.f32 1.442695, %v767_v47  ;;  %v755_v58 = vadd.f32 %v2492_v48, %v659_v51  ;;  %v794_v60 = vmul.f32 %v752_v57, %v744_v52 }
 0x39d   :  { %v746_v56 = vpop.f32.mrf.mxu0  ;;  %v843_v51 = vmul.f32 1.442695, %v839_v35  ;;  %v840_v52 = vsub.f32 0.0, %v3306_v36 }
 0x39e   :  { %v747_v59 = vadd.f32 %v746_v56, %v649_v34  ;;  %2658 = vpow2.f32 %v772_v55  ;;  %v849_v55 = vmul.f32 1.442695, %v842_v37 }
 0x3a0   :  { %v795_v61 = vmul.f32 %v755_v58, %v747_v59 }
 0x3a2   :  { %v796_v62 = vadd.f32 %v795_v61, %v794_v60  ;;  %v845_v61 = vmul.f32 1.442695, %v840_v52 }
 0x3a4   :  { %v797_v1 = vrot.slane %v796_v62, 4 }
 0x3a5   :  { %v2653_v63 = vpop.eup %2652 }
 0x3a6   :  { %v780_v0 = vadd.f32 1.0, %v2653_v63  ;;  %v798_v7 = vadd.f32 %v797_v1, %v796_v62 }
 0x3a7   :  { %v2655_v2 = vpop.eup %2654 }
 0x3a8   :  { %2660 = vlog2.f32 %v780_v0  ;;  %v778_v4 = vadd.f32 1.0, %v2655_v2  ;;  %v799_v16 = vrot.slane %v798_v7, 2 }
 0x3a9   :  { %v2657_v5 = vpop.eup %2656 }
 0x3aa   :  { %2662 = vlog2.f32 %v778_v4  ;;  %v781_v6 = vadd.f32 1.0, %v2657_v5  ;;  %v800_v21 = vadd.f32 %v799_v16, %v798_v7 }
 0x3ab   :  { %v2659_v10 = vpop.eup %2658 }
 0x3ac   :  { %2664 = vlog2.f32 %v781_v6  ;;  %v779_v15 = vadd.f32 1.0, %v2659_v10  ;;  %v801_v33 = vrot.slane %v800_v21, 1 }
 0x3ae   :  { %2666 = vlog2.f32 %v779_v15  ;;  %v802_v48 = vadd.f32 %v801_v33, %v800_v21 }
 0x3af   :  { %2668 = vpow2.f32 %v847_v43 }
 0x3b0   :  { %2670 = vpow2.f32 %v843_v51 }
 0x3b1   :  { %2672 = vpow2.f32 %v849_v55 }
 0x3b5   :  { %v2661_v26 = vpop.eup %2660 }
 0x3b6   :  { %v787_v31 = vmul.f32 0.6931472, %v2661_v26 }
 0x3b7   :  { %v2663_v34 = vpop.eup %2662 }
 0x3b8   :  { %v792_v38 = vadd.f32 %v787_v31, %v760_v30  ;;  %v783_v41 = vmul.f32 0.6931472, %v2663_v34 }
 0x3b9   :  { %v2665_v42 = vpop.eup %2664 }
 0x3ba   :  { %v805_v45 = vmul.f32 %v792_v38, %v3257_v8  ;;  %v790_v24 = vadd.f32 %v783_v41, %v758_v40  ;;  %v789_v47 = vmul.f32 0.6931472, %v2665_v42 }
 0x3bb   :  { %v2667_v54 = vpop.eup %2666 }
 0x3bc   :  { %v803_v56 = vmul.f32 %v790_v24, %v3261_v12  ;;  %v793_v57 = vadd.f32 %v789_v47, %v761_v44  ;;  %v809_v58 = vmul.f32 %v805_v45, %v802_v48  ;;  %v785_v59 = vmul.f32 0.6931472, %v2667_v54  ;;  %v2669_v6 = vpop.eup %2668 }
 0x3bd   :  { %v2671_v7 = vpop.eup %2670  ;;  %v853_v11 = vadd.f32 1.0, %v2669_v6 }
 0x3be   :  { %v806_v32 = vmul.f32 %v793_v57, %v3259_v9  ;;  %v813_v60 = vsub.f32 0.0, %v809_v58  ;;  %v807_v8 = vmul.f32 %v803_v56, %v802_v48  ;;  %v791_v62 = vadd.f32 %v785_v59, %v759_v28  ;;  %v2673_v10 = vpop.eup %2672 }
 0x3bf   :  { %v851_v15 = vadd.f32 1.0, %v2671_v7  ;;  %v854_v17 = vadd.f32 1.0, %v2673_v10 }
 0x3c0   :  { %v810_v63 = vmul.f32 %v806_v32, %v802_v48  ;;  %v819_v0 = vmul.f32 1.442695, %v813_v60  ;;  %v811_v1 = vsub.f32 0.0, %v807_v8  ;;  %v804_v2 = vmul.f32 %v791_v62, %v3265_v14 }
 0x3c2   :  { %v814_v12 = vsub.f32 0.0, %v810_v63  ;;  %2674 = vpow2.f32 %v819_v0  ;;  %v815_v3 = vmul.f32 1.442695, %v811_v1  ;;  %v808_v4 = vmul.f32 %v804_v2, %v802_v48 }
 0x3c3   :  { %2676 = vpow2.f32 %v845_v61 }
 0x3c4   :  { %v821_v39 = vmul.f32 1.442695, %v814_v12  ;;  %2678 = vpow2.f32 %v815_v3  ;;  %v812_v5 = vsub.f32 0.0, %v808_v4 }
 0x3c6   :  { %2680 = vpow2.f32 %v821_v39  ;;  %v817_v9 = vmul.f32 1.442695, %v812_v5 }
 0x3c8   :  { %2682 = vpow2.f32 %v817_v9 }
 0x3c9   :  { %2684 = vrcp.f32 %v853_v11 }
 0x3cf   :  { %v2675_v13 = vpop.eup %2674 }
 0x3d0   :  { %v2677_v16 = vpop.eup %2676  ;;  %v825_v14 = vadd.f32 1.0, %v2675_v13 }
 0x3d1   :  { %v2679_v18 = vpop.eup %2678  ;;  %v852_v25 = vadd.f32 1.0, %v2677_v16 }
 0x3d2   :  { %2686 = vrcp.f32 %v825_v14  ;;  %v823_v20 = vadd.f32 1.0, %v2679_v18 }
 0x3d3   :  { %v2681_v21 = vpop.eup %2680  ;;  %2688 = vrcp.f32 %v851_v15 }
 0x3d4   :  { %2690 = vrcp.f32 %v854_v17  ;;  %v826_v26 = vadd.f32 1.0, %v2681_v21 }
 0x3d5   :  { %2692 = vrcp.f32 %v823_v20  ;;  %v2683_v27 = vpop.eup %2682 }
 0x3d6   :  { %2694 = vrcp.f32 %v826_v26  ;;  %v824_v29 = vadd.f32 1.0, %v2683_v27  ;;  %v2685_v30 = vpop.eup %2684 }
 0x3d7   :  { %2696 = vrcp.f32 %v852_v25  ;;  %v865_v41 = vmul.f32 %v2685_v30, %v3297_v19  ;;  %v2609_v19 = vld [vmem:[%s3588_s12 + $0x8] sm:$0xff]  }
 0x3d8   :  { %2698 = vrcp.f32 %v824_v29 }
 0x3df   :  { %v2687_v31 = vpop.eup %2686 }
 0x3e0   :  { %v2689_v33 = vpop.eup %2688  ;;  %v837_v37 = vmul.f32 %v2687_v31, %v809_v58 }
 0x3e1   :  { %v2691_v34 = vpop.eup %2690  ;;  %v863_v48 = vmul.f32 %v2689_v33, %v3299_v22  ;;  %v2610_v22 = vld [vmem:[%s3582_s6 + $0x20] sm:$0xff]  }
 0x3e2   :  { %v2693_v35 = vpop.eup %2692  ;;  %v866_v42 = vmul.f32 %v2691_v34, %v3301_v23  ;;  %v869_v24 = vmul.f32 %v865_v41, %v837_v37  ;;  %v876_v23 = vpop.permute.xlu0 %875  ;;  %v2613_v41 = vld [vmem:[%s3582_s6 + $0x38] sm:$0xff]  }
 0x3e3   :  { %v2695_v38 = vpop.eup %2694  ;;  %v835_v44 = vmul.f32 %v2693_v35, %v807_v8 }
 0x3e4   :  { %v2697_v40 = vpop.eup %2696  ;;  %v838_v43 = vmul.f32 %v2695_v38, %v810_v63  ;;  %v2611_v38 = vld [vmem:[%s3582_s6 + $0x28] sm:$0xff]  }
 0x3e5   :  { %v2699_v45 = vpop.eup %2698  ;;  %v864_v51 = vmul.f32 %v2697_v40, %v3306_v36  ;;  %v867_v55 = vmul.f32 %v863_v48, %v835_v44  ;;  %v881_v36 = vpop.permute.xlu1 %880  ;;  %v2612_v40 = vld [vmem:[%s3582_s6 + $0x30] sm:$0xff]  }
 0x3e6   :  { %v870_v47 = vmul.f32 %v866_v42, %v838_v43  ;;  %v836_v52 = vmul.f32 %v2699_v45, %v808_v4  ;;  %v886_v32 = vpop.permute.xlu0 %885  ;;  %v2614_v42 = vld [vmem:[%s3584_s8 + $0x10] sm:$0xff]  }
 0x3e7   :  { %2517 = vmatprep.mubr.msk.bf16.mxu0 %vm426_vm2, %v2614_v42 }
 0x3e8   :  { %v872_v54 = vpack.c.bf16 %v870_v47, %v869_v24  ;;  %v868_v56 = vmul.f32 %v864_v51, %v836_v52 }
 0x3e9   :  { %v891_v61 = vpop.permute.xlu1 %890 }
 0x3ea   :  { %2493 = vmatprep.subr.bf16.mxu1 %v872_v54  ;;  %v871_v57 = vpack.c.bf16 %v868_v56, %v867_v55  ;;  %v995_v14 = vpop.permute.xlu0 %994 }
 0x3eb   :  { %2494 = vmatpush3.bf16.msra.mxu1 %v872_v54 }
 0x3ec   :  { %2495 = vmatprep.subr.bf16.mxu1 %v871_v57 }
 0x3ed   :  { %v1000_v17 = vpop.permute.xlu1 %999 }
 0x3ee   :  { %v985_v29 = vpop.permute.xlu0 %984 }
 0x3ef   :  { %2496 = vmatpush3.bf16.msra.mxu1 %v871_v57 }
 0x3f1   :  { %v990_v27 = vpop.permute.xlu1 %989 }
 0x3f2   :  { %2498 = vmatmul.mubr.msk.bf16.vlgmr.msra.gmra.mxu1 %vm426_vm2, %v2609_v19  ;;  %v1021_v43 = vpop.permute.xlu0 %1020 }
 0x3f3   :  { %2505 = vmatprep.mubr.msk.bf16.mxu1 %vm426_vm2, %v2610_v22 }
 0x3f5   :  { %v1026_v44 = vpop.permute.xlu1 %1025 }
 0x3f6   :  { %v1011_v47 = vpop.permute.xlu0 %1010 }
 0x3f9   :  { %v1016_v19 = vpop.permute.xlu1 %1015 }
 0x4b2   :  { %v2499_v58 = vpop.f32.mrf.mxu1 }
 0x4b3   :  { %v952_v8 = vadd.f32 %v2499_v58, %v886_v32 }
 0x4b4   :  { %v943_v28 = vpop.f32.mrf.mxu1 }
 0x4b5   :  { %v944_v59 = vadd.f32 %v943_v28, %v876_v23  ;;  %v3333_v2 = vadd.f32 %v952_v8, %v3215_v49 }
 0x4b6   :  { %v2500_v60 = vpop.f32.mrf.mxu1 }
 0x4b7   :  { %v3330_v63 = vadd.f32 %v944_v59, %v3213_v46  ;;  %v955_v0 = vadd.f32 %v2500_v60, %v891_v61  ;;  %v964_v46 = vmul.f32 %v3333_v2, %v3333_v2 }
 0x4b8   :  { %v946_v62 = vpop.f32.mrf.mxu1 }
 0x4b9   :  { %v947_v1 = vadd.f32 %v946_v62, %v881_v36  ;;  %v962_v3 = vmul.f32 %v3330_v63, %v3330_v63  ;;  %v3341_v4 = vadd.f32 %v955_v0, %v3223_v53 }
 0x4bb   :  { %v3336_v12 = vadd.f32 %v947_v1, %v3217_v50  ;;  %v965_v49 = vmul.f32 %v3341_v4, %v3341_v4 }
 0x4bd   :  { %v963_v39 = vmul.f32 %v3336_v12, %v3336_v12 }
 0x4bf   :  { %v966_v5 = vadd.f32 %v963_v39, %v962_v3 }
 0x4c1   :  { %v967_v9 = vadd.f32 %v966_v5, %v964_v46 }
 0x4c3   :  { %v968_v6 = vadd.f32 %v967_v9, %v965_v49 }
 0x4c5   :  { %v969_v50 = vrot.slane %v968_v6, 4 }
 0x4c7   :  { %v970_v7 = vadd.f32 %v969_v50, %v968_v6 }
 0x4c9   :  { %v971_v10 = vrot.slane %v970_v7, 2 }
 0x4cb   :  { %v972_v11 = vadd.f32 %v971_v10, %v970_v7 }
 0x4cd   :  { %v973_v13 = vrot.slane %v972_v11, 1 }
 0x4cf   :  { %v974_v15 = vadd.f32 %v973_v13, %v972_v11 }
 0x4d1   :  { %v975_v53 = vmul.f32 0.03125, %v974_v15  ;;  %v2615_v15 = vld [vmem:[%s3584_s8 + $0x18] sm:$0xff]  }
 0x4d3   :  { %v976_v16 = vadd.f32 1e-05, %v975_v53  ;;  %v2616_v53 = vld [vmem:[%s3586_s10 + $0x20] sm:$0xff]  }
 0x4d5   :  { %2700 = vrsqrt.f32 %v976_v16  ;;  %v1193_v16 = vpop.permute.xlu1 %1192 }
 0x4e2   :  { %v2701_v18 = vpop.eup %2700 }
 0x4e3   :  { %v979_v20 = vmul.f32 %v2701_v18, %v3336_v12  ;;  %v980_v21 = vmul.f32 %v2701_v18, %v3333_v2  ;;  %v981_v25 = vmul.f32 %v2701_v18, %v3341_v4  ;;  %v978_v26 = vmul.f32 %v2701_v18, %v3330_v63 }
 0x4e5   :  { %v1004_v30 = vmul.f32 %v995_v14, %v980_v21  ;;  %v1005_v31 = vmul.f32 %v1000_v17, %v981_v25  ;;  %v1002_v33 = vmul.f32 %v985_v29, %v978_v26  ;;  %v1003_v34 = vmul.f32 %v990_v27, %v979_v20  ;;  %v1188_v17 = vpop.permute.xlu0 %1187  ;;  %v1183_v21 = vpop.permute.xlu1 %1182 }
 0x4e7   :  { %v1007_v35 = vpack.c.bf16 %v1005_v31, %v1004_v30  ;;  %v1006_v37 = vpack.c.bf16 %v1003_v34, %v1002_v33 }
 0x4e9   :  { %2501 = vmatprep.subr.bf16.mxu1 %v1007_v35  ;;  %v1178_v27 = vpop.permute.xlu0 %1177 }
 0x4ea   :  { %2502 = vmatpush3.bf16.msra.mxu1 %v1007_v35  ;;  %v2617_v35 = vld [vmem:[%s3586_s10 + $0x28] sm:$0xff]  }
 0x4eb   :  { %2503 = vmatprep.subr.bf16.mxu1 %v1006_v37 }
 0x4ed   :  { %v1275_v42 = vpop.permute.xlu0 %1274 }
 0x4ee   :  { %2504 = vmatpush3.bf16.msra.mxu1 %v1006_v37  ;;  %v2618_v37 = vld [vmem:[%s3586_s10 + $0x30] sm:$0xff]  }
 0x4f1   :  { %2506 = vmatmul.mubr.msk.bf16.vlgmr.msra.gmra.mxu1 %vm426_vm2, %v2611_v38  ;;  %v2619_v38 = vld [vmem:[%s3586_s10 + $0x38] sm:$0xff]  }
 0x4f2   :  { %2509 = vmatprep.mubr.msk.bf16.mxu1 %vm426_vm2, %v2612_v40  ;;  %v2620_v40 = vld [vmem:[%s3588_s12 + $0x10] sm:$0xff]  }
 0x4f9   :  { %2510 = vmatmul.mubr.msk.bf16.gmra.mxu1 %vm426_vm2, %v2613_v41  ;;  %v1280_v41 = vpop.permute.xlu1 %1279 }
 0x4fa   :  { %2537 = vmatprep.mubr.msk.bf16.mxu1 %vm426_vm2, %v2620_v40 }
 0x5b1   :  { %v2507_v45 = vpop.f32.mrf.mxu1 }
 0x5b2   :  { %v1123_v24 = vadd.f32 %v2507_v45, %v1021_v43 }
 0x5b3   :  { %v1114_v48 = vpop.f32.mrf.mxu1 }
 0x5b4   :  { %v1147_v51 = vsub.f32 0.0, %v1123_v24  ;;  %v1115_v52 = vadd.f32 %v1114_v48, %v1011_v47 }
 0x5b5   :  { %v2508_v54 = vpop.f32.mrf.mxu1 }
 0x5b6   :  { %v1153_v55 = vmul.f32 1.442695, %v1147_v51  ;;  %v1145_v56 = vsub.f32 0.0, %v1115_v52  ;;  %v1126_v57 = vadd.f32 %v2508_v54, %v1026_v44  ;;  %v1270_v44 = vpop.permute.xlu1 %1269 }
 0x5b7   :  { %v1117_v22 = vpop.f32.mrf.mxu1 }
 0x5b8   :  { %2702 = vpow2.f32 %v1153_v55  ;;  %v1149_v23 = vmul.f32 1.442695, %v1145_v56  ;;  %v1148_v36 = vsub.f32 0.0, %v1126_v57  ;;  %v1118_v58 = vadd.f32 %v1117_v22, %v1016_v19 }
 0x5ba   :  { %2704 = vpow2.f32 %v1149_v23  ;;  %v1155_v28 = vmul.f32 1.442695, %v1148_v36  ;;  %v1146_v59 = vsub.f32 0.0, %v1118_v58  ;;  %v1290_v19 = vpop.permute.xlu1 %1289 }
 0x5bc   :  { %2706 = vpow2.f32 %v1155_v28  ;;  %v1151_v32 = vmul.f32 1.442695, %v1146_v59 }
 0x5be   :  { %2708 = vpow2.f32 %v1151_v32 }
 0x5c5   :  { %v2703_v60 = vpop.eup %2702 }
 0x5c6   :  { %v1159_v8 = vadd.f32 1.0, %v2703_v60 }
 0x5c7   :  { %v2705_v61 = vpop.eup %2704 }
 0x5c8   :  { %v1157_v62 = vadd.f32 1.0, %v2705_v61  ;;  %2710 = vrcp.f32 %v1159_v8 }
 0x5c9   :  { %v2707_v0 = vpop.eup %2706 }
 0x5ca   :  { %v1160_v1 = vadd.f32 1.0, %v2707_v0  ;;  %2712 = vrcp.f32 %v1157_v62 }
 0x5cb   :  { %v2709_v3 = vpop.eup %2708 }
 0x5cc   :  { %2714 = vrcp.f32 %v1160_v1  ;;  %v1158_v39 = vadd.f32 1.0, %v2709_v3  ;;  %v1300_v3 = vpop.permute.xlu1 %1299 }
 0x5ce   :  { %2716 = vrcp.f32 %v1158_v39 }
 0x5d5   :  { %v2711_v46 = vpop.eup %2710 }
 0x5d6   :  { %v1171_v9 = vmul.f32 %v2711_v46, %v1123_v24  ;;  %v1265_v24 = vpop.permute.xlu0 %1264 }
 0x5d7   :  { %v2713_v5 = vpop.eup %2712 }
 0x5d8   :  { %v1169_v7 = vmul.f32 %v2713_v5, %v1115_v52 }
 0x5d9   :  { %v2715_v49 = vpop.eup %2714 }
 0x5da   :  { %v1172_v6 = vmul.f32 %v2715_v49, %v1126_v57 }
 0x5db   :  { %v2717_v50 = vpop.eup %2716 }
 0x5dc   :  { %v1170_v10 = vmul.f32 %v2717_v50, %v1118_v58  ;;  %v1174_v11 = vpack.c.bf16 %v1172_v6, %v1171_v9  ;;  %v1285_v58 = vpop.permute.xlu0 %1284 }
 0x5de   :  { %2513 = vmatprep.subr.bf16.mxu0 %v1174_v11  ;;  %v1173_v13 = vpack.c.bf16 %v1170_v10, %v1169_v7 }
 0x5df   :  { %2514 = vmatpush3.bf16.msra.mxu0 %v1174_v11 }
 0x5e0   :  { %2515 = vmatprep.subr.bf16.mxu0 %v1173_v13  ;;  %v1295_v46 = vpop.permute.xlu0 %1294 }
 0x5e3   :  { %2516 = vmatpush3.bf16.msra.mxu0 %v1173_v13 }
 0x5e6   :  { %2518 = vmatmul.mubr.msk.bf16.vlgmr.msra.gmra.mxu0 %vm426_vm2, %v2615_v15 }
 0x5e7   :  { %2525 = vmatprep.mubr.msk.bf16.mxu0 %vm426_vm2, %v2616_v53 }
 0x6a6   :  { %v2519_v14 = vpop.f32.mrf.mxu0 }
 0x6a7   :  { %v3377_v25 = vadd.f32 %v2519_v14, %v1188_v17  ;;  %v2511_v17 = vpop.f32.mrf.mxu1 }
 0x6a8   :  { %v1245_v18 = vpop.f32.mrf.mxu0 }
 0x6a9   :  { %v3381_v30 = vadd.f32 %v1245_v18, %v1178_v27 }
 0x6aa   :  { %v2520_v20 = vpop.f32.mrf.mxu0 }
 0x6ab   :  { %v3379_v26 = vadd.f32 %v2520_v20, %v1193_v16 }
 0x6ac   :  { %v1248_v29 = vpop.f32.mrf.mxu0 }
 0x6ad   :  { %v1261_v31 = vpack.c.bf16 %v3379_v26, %v3377_v25  ;;  %v3385_v33 = vadd.f32 %v1248_v29, %v1183_v21  ;;  %v1041_v29 = vpop.permute.xlu0 %1040 }
 0x6ae   :  { %v3417_v40 = vadd.f32 %v2511_v17, %v1041_v29 }
 0x6af   :  { %v1260_v34 = vpack.c.bf16 %v3385_v33, %v3381_v30  ;;  %2521 = vmatprep.subr.bf16.mxu0 %v1261_v31 }
 0x6b0   :  { %2522 = vmatpush3.bf16.msra.mxu0 %v1261_v31  ;;  %v1130_v31 = vpop.f32.mrf.mxu1 }
 0x6b1   :  { %2523 = vmatprep.subr.bf16.mxu0 %v1260_v34 }
 0x6b4   :  { %2524 = vmatpush3.bf16.msra.mxu0 %v1260_v34 }
 0x6b7   :  { %2526 = vmatmul.mubr.msk.bf16.vlgmr.msra.gmra.mxu0 %vm426_vm2, %v2617_v35 }
 0x6b8   :  { %2529 = vmatprep.mubr.msk.bf16.mxu0 %vm426_vm2, %v2618_v37  ;;  %v1046_v37 = vpop.permute.xlu1 %1045 }
 0x6bf   :  { %2530 = vmatmul.mubr.msk.bf16.gmra.mxu0 %vm426_vm2, %v2619_v38  ;;  %v2512_v38 = vpop.f32.mrf.mxu1 }
 0x777   :  { %v2527_v43 = vpop.f32.mrf.mxu0 }
 0x778   :  { %v3405_v45 = vadd.f32 %v2527_v43, %v1275_v42 }
 0x779   :  { %v1368_v47 = vpop.f32.mrf.mxu0 }
 0x77a   :  { %v1405_v48 = vand.u32 2147483647, %v3405_v45  ;;  %v3408_v51 = vadd.f32 %v1368_v47, %v1265_v24  ;;  %v1133_v24 = vpop.f32.mrf.mxu1 }
 0x77b   :  { %v2528_v52 = vpop.f32.mrf.mxu0 }
 0x77c   :  { %v1409_v54 = vsub.f32 0.0, %v1405_v48  ;;  %v1403_v55 = vand.u32 2147483647, %v3408_v51  ;;  %v3411_v56 = vadd.f32 %v2528_v52, %v1280_v41  ;;  %v1031_v41 = vpop.permute.xlu0 %1030  ;;  %v1482_v48 = vsub.f32 0.0, %v3417_v40  ;;  %v1036_v52 = vpop.permute.xlu1 %1035 }
 0x77d   :  { %v1371_v57 = vpop.f32.mrf.mxu0  ;;  %v3419_v43 = vadd.f32 %v1130_v31, %v1031_v41 }
 0x77e   :  { %v1415_v22 = vmul.f32 1.442695, %v1409_v54  ;;  %v1407_v23 = vsub.f32 0.0, %v1403_v55  ;;  %v1406_v36 = vand.u32 2147483647, %v3411_v56  ;;  %v3414_v28 = vadd.f32 %v1371_v57, %v1270_v44 }
 0x77f   :  { %v2531_v59 = vpop.f32.mrf.mxu0  ;;  %v3421_v44 = vadd.f32 %v2512_v38, %v1046_v37  ;;  %v1401_v54 = vmax.f32 %v3405_v45, 0.0 }
 0x780   :  { %2718 = vpow2.f32 %v1415_v22  ;;  %v1411_v32 = vmul.f32 1.442695, %v1407_v23  ;;  %v1410_v60 = vsub.f32 0.0, %v1406_v36  ;;  %v1404_v8 = vand.u32 2147483647, %v3414_v28 }
 0x781   :  { %v1384_v61 = vpop.f32.mrf.mxu0  ;;  %v1393_v9 = vadd.f32 %v2531_v59, %v1295_v46  ;;  %v1480_v22 = vsub.f32 0.0, %v3419_v43  ;;  %v3426_v23 = vadd.f32 %v1133_v24, %v1036_v52  ;;  %v1483_v36 = vsub.f32 0.0, %v3421_v44 }
 0x782   :  { %2720 = vpow2.f32 %v1411_v32  ;;  %v1417_v62 = vmul.f32 1.442695, %v1410_v60  ;;  %v1408_v0 = vsub.f32 0.0, %v1404_v8  ;;  %v1385_v39 = vadd.f32 %v1384_v61, %v1285_v58 }
 0x783   :  { %v2532_v1 = vpop.f32.mrf.mxu0  ;;  %v1399_v59 = vmax.f32 %v3408_v51, 0.0  ;;  %v1488_v8 = vmul.f32 1.442695, %v1482_v48  ;;  %v1402_v61 = vmax.f32 %v3411_v56, 0.0  ;;  %v1400_v51 = vmax.f32 %v3414_v28, 0.0 }
 0x784   :  { %2722 = vpow2.f32 %v1417_v62  ;;  %v1413_v5 = vmul.f32 1.442695, %v1408_v0  ;;  %v1396_v6 = vadd.f32 %v2532_v1, %v1300_v3  ;;  %v1435_v7 = vmul.f32 %v1393_v9, %v1385_v39 }
 0x785   :  { %v1387_v49 = vpop.f32.mrf.mxu0  ;;  %v1484_v3 = vmul.f32 1.442695, %v1480_v22  ;;  %v1481_v39 = vsub.f32 0.0, %v3426_v23 }
 0x786   :  { %v1388_v50 = vadd.f32 %v1387_v49, %v1290_v19  ;;  %2724 = vpow2.f32 %v1413_v5  ;;  %v1490_v5 = vmul.f32 1.442695, %v1483_v36 }
 0x788   :  { %v1436_v10 = vmul.f32 %v1396_v6, %v1388_v50 }
 0x78a   :  { %v1437_v11 = vadd.f32 %v1436_v10, %v1435_v7  ;;  %v1486_v10 = vmul.f32 1.442695, %v1481_v39 }
 0x78c   :  { %v1438_v53 = vrot.slane %v1437_v11, 4 }
 0x78d   :  { %v2719_v13 = vpop.eup %2718 }
 0x78e   :  { %v1421_v15 = vadd.f32 1.0, %v2719_v13  ;;  %v1439_v21 = vadd.f32 %v1438_v53, %v1437_v11 }
 0x78f   :  { %v2721_v16 = vpop.eup %2720 }
 0x790   :  { %2726 = vlog2.f32 %v1421_v15  ;;  %v1419_v14 = vadd.f32 1.0, %v2721_v16  ;;  %v1440_v35 = vrot.slane %v1439_v21, 2 }
 0x791   :  { %v2723_v18 = vpop.eup %2722 }
 0x792   :  { %2728 = vlog2.f32 %v1419_v14  ;;  %v1422_v20 = vadd.f32 1.0, %v2723_v18  ;;  %v1441_v42 = vadd.f32 %v1440_v35, %v1439_v21 }
 0x793   :  { %v2725_v27 = vpop.eup %2724 }
 0x794   :  { %2730 = vlog2.f32 %v1422_v20  ;;  %v1420_v34 = vadd.f32 1.0, %v2725_v27  ;;  %v1442_v57 = vrot.slane %v1441_v42, 1 }
 0x796   :  { %2732 = vlog2.f32 %v1420_v34  ;;  %v1443_v1 = vadd.f32 %v1442_v57, %v1441_v42 }
 0x797   :  { %2734 = vpow2.f32 %v1488_v8 }
 0x798   :  { %2736 = vpow2.f32 %v1484_v3 }
 0x799   :  { %2738 = vpow2.f32 %v1490_v5 }
 0x79d   :  { %v2727_v47 = vpop.eup %2726 }
 0x79e   :  { %v1428_v55 = vmul.f32 0.6931472, %v2727_v47 }
 0x79f   :  { %v2729_v19 = vpop.eup %2728 }
 0x7a0   :  { %v1433_v58 = vadd.f32 %v1428_v55, %v1401_v54  ;;  %v1424_v32 = vmul.f32 0.6931472, %v2729_v19 }
 0x7a1   :  { %v2731_v60 = vpop.eup %2730 }
 0x7a2   :  { %v1446_v62 = vmul.f32 %v1433_v58, %v3377_v25  ;;  %v1431_v45 = vadd.f32 %v1424_v32, %v1399_v59  ;;  %v1430_v0 = vmul.f32 0.6931472, %v2731_v60 }
 0x7a3   :  { %v2733_v46 = vpop.eup %2732 }
 0x7a4   :  { %v1444_v49 = vmul.f32 %v1431_v45, %v3381_v30  ;;  %v1434_v9 = vadd.f32 %v1430_v0, %v1402_v61  ;;  %v1450_v6 = vmul.f32 %v1446_v62, %v1443_v1  ;;  %v1426_v50 = vmul.f32 0.6931472, %v2733_v46  ;;  %v2735_v20 = vpop.eup %2734 }
 0x7a5   :  { %v2737_v21 = vpop.eup %2736  ;;  %v1494_v29 = vadd.f32 1.0, %v2735_v20 }
 0x7a6   :  { %v1447_v56 = vmul.f32 %v1434_v9, %v3379_v26  ;;  %v1454_v7 = vsub.f32 0.0, %v1450_v6  ;;  %v1448_v25 = vmul.f32 %v1444_v49, %v1443_v1  ;;  %v1432_v11 = vadd.f32 %v1426_v50, %v1400_v51  ;;  %v2739_v27 = vpop.eup %2738 }
 0x7a7   :  { %v1492_v34 = vadd.f32 1.0, %v2737_v21  ;;  %v1495_v37 = vadd.f32 1.0, %v2739_v27 }
 0x7a8   :  { %v1451_v13 = vmul.f32 %v1447_v56, %v1443_v1  ;;  %v1460_v15 = vmul.f32 1.442695, %v1454_v7  ;;  %v1452_v53 = vsub.f32 0.0, %v1448_v25  ;;  %v1445_v16 = vmul.f32 %v1432_v11, %v3385_v33 }
 0x7aa   :  { %v1455_v30 = vsub.f32 0.0, %v1451_v13  ;;  %2740 = vpow2.f32 %v1460_v15  ;;  %v1456_v17 = vmul.f32 1.442695, %v1452_v53  ;;  %v1449_v14 = vmul.f32 %v1445_v16, %v1443_v1 }
 0x7ab   :  { %2742 = vpow2.f32 %v1486_v10 }
 0x7ac   :  { %v1462_v28 = vmul.f32 1.442695, %v1455_v30  ;;  %2744 = vpow2.f32 %v1456_v17  ;;  %v1453_v18 = vsub.f32 0.0, %v1449_v14 }
 0x7ae   :  { %2746 = vpow2.f32 %v1462_v28  ;;  %v1458_v26 = vmul.f32 1.442695, %v1453_v18 }
 0x7b0   :  { %2748 = vpow2.f32 %v1458_v26 }
 0x7b1   :  { %2750 = vrcp.f32 %v1494_v29 }
 0x7b7   :  { %v2741_v31 = vpop.eup %2740 }
 0x7b8   :  { %v2743_v35 = vpop.eup %2742  ;;  %v1466_v33 = vadd.f32 1.0, %v2741_v31 }
 0x7b9   :  { %v2745_v38 = vpop.eup %2744  ;;  %v1493_v24 = vadd.f32 1.0, %v2743_v35 }
 0x7ba   :  { %2752 = vrcp.f32 %v1466_v33  ;;  %v1464_v41 = vadd.f32 1.0, %v2745_v38 }
 0x7bb   :  { %v2747_v42 = vpop.eup %2746  ;;  %2754 = vrcp.f32 %v1492_v34 }
 0x7bc   :  { %2756 = vrcp.f32 %v1495_v37  ;;  %v1467_v47 = vadd.f32 1.0, %v2747_v42 }
 0x7bd   :  { %2758 = vrcp.f32 %v1464_v41  ;;  %v2749_v48 = vpop.eup %2748 }
 0x7be   :  { %2760 = vrcp.f32 %v1467_v47  ;;  %v1465_v52 = vadd.f32 1.0, %v2749_v48  ;;  %v2751_v54 = vpop.eup %2750 }
 0x7bf   :  { %2762 = vrcp.f32 %v1493_v24  ;;  %v1506_v32 = vmul.f32 %v2751_v54, %v3417_v40  ;;  %v2621_v40 = vld [vmem:[%s3588_s12 + $0x18] sm:$0xff]  }
 0x7c0   :  { %2764 = vrcp.f32 %v1465_v52 }
 0x7c7   :  { %v2753_v55 = vpop.eup %2752 }
 0x7c8   :  { %v2755_v57 = vpop.eup %2754  ;;  %v1478_v36 = vmul.f32 %v2753_v55, %v1450_v6 }
 0x7c9   :  { %v2757_v19 = vpop.eup %2756  ;;  %v1504_v1 = vmul.f32 %v2755_v57, %v3419_v43  ;;  %v2622_v43 = vld [vmem:[%s3582_s6 + $0x40] sm:$0xff]  }
 0x7ca   :  { %v2759_v22 = vpop.eup %2758  ;;  %v1507_v60 = vmul.f32 %v2757_v19, %v3421_v44  ;;  %v1510_v45 = vmul.f32 %v1506_v32, %v1478_v36  ;;  %v1517_v44 = vpop.permute.xlu0 %1516  ;;  %v2625_v32 = vld [vmem:[%s3582_s6 + $0x58] sm:$0xff]  }
 0x7cb   :  { %v2761_v58 = vpop.eup %2760  ;;  %v1476_v61 = vmul.f32 %v2759_v22, %v1448_v25 }
 0x7cc   :  { %v2763_v59 = vpop.eup %2762  ;;  %v1479_v8 = vmul.f32 %v2761_v58, %v1451_v13  ;;  %v2623_v58 = vld [vmem:[%s3582_s6 + $0x48] sm:$0xff]  }
 0x7cd   :  { %v2765_v62 = vpop.eup %2764  ;;  %v1505_v3 = vmul.f32 %v2763_v59, %v3426_v23  ;;  %v1508_v5 = vmul.f32 %v1504_v1, %v1476_v61  ;;  %v1522_v23 = vpop.permute.xlu1 %1521  ;;  %v2624_v59 = vld [vmem:[%s3582_s6 + $0x50] sm:$0xff]  }
 0x7ce   :  { %v1511_v0 = vmul.f32 %v1507_v60, %v1479_v8  ;;  %v1477_v39 = vmul.f32 %v2765_v62, %v1449_v14  ;;  %v1527_v56 = vpop.permute.xlu0 %1526  ;;  %v2626_v60 = vld [vmem:[%s3584_s8 + $0x20] sm:$0xff]  }
 0x7cf   :  { %2557 = vmatprep.mubr.msk.bf16.mxu0 %vm426_vm2, %v2626_v60 }
 0x7d0   :  { %v1513_v46 = vpack.c.bf16 %v1511_v0, %v1510_v45  ;;  %v1509_v49 = vmul.f32 %v1505_v3, %v1477_v39 }
 0x7d1   :  { %v1532_v10 = vpop.permute.xlu1 %1531 }
 0x7d2   :  { %2533 = vmatprep.subr.bf16.mxu1 %v1513_v46  ;;  %v1512_v9 = vpack.c.bf16 %v1509_v49, %v1508_v5  ;;  %v1636_v33 = vpop.permute.xlu0 %1635 }
 0x7d3   :  { %2534 = vmatpush3.bf16.msra.mxu1 %v1513_v46 }
 0x7d4   :  { %2535 = vmatprep.subr.bf16.mxu1 %v1512_v9 }
 0x7d5   :  { %v1641_v37 = vpop.permute.xlu1 %1640 }
 0x7d6   :  { %v1626_v52 = vpop.permute.xlu0 %1625 }
 0x7d7   :  { %2536 = vmatpush3.bf16.msra.mxu1 %v1512_v9 }
 0x7d9   :  { %v1631_v48 = vpop.permute.xlu1 %1630 }
 0x7da   :  { %2538 = vmatmul.mubr.msk.bf16.vlgmr.msra.gmra.mxu1 %vm426_vm2, %v2621_v40  ;;  %v1662_v8 = vpop.permute.xlu0 %1661 }
 0x7db   :  { %2545 = vmatprep.mubr.msk.bf16.mxu1 %vm426_vm2, %v2622_v43 }
 0x7dd   :  { %v1667_v61 = vpop.permute.xlu1 %1666 }
 0x7de   :  { %v1652_v0 = vpop.permute.xlu0 %1651 }
 0x7e1   :  { %v1657_v40 = vpop.permute.xlu1 %1656 }
 0x89a   :  { %v2539_v6 = vpop.f32.mrf.mxu1 }
 0x89b   :  { %v1593_v25 = vadd.f32 %v2539_v6, %v1527_v56 }
 0x89c   :  { %v1584_v51 = vpop.f32.mrf.mxu1 }
 0x89d   :  { %v1585_v50 = vadd.f32 %v1584_v51, %v1517_v44  ;;  %v3453_v16 = vadd.f32 %v1593_v25, %v3333_v2 }
 0x89e   :  { %v2540_v7 = vpop.f32.mrf.mxu1 }
 0x89f   :  { %v3450_v13 = vadd.f32 %v1585_v50, %v3330_v63  ;;  %v1596_v15 = vadd.f32 %v2540_v7, %v1532_v10  ;;  %v1605_v63 = vmul.f32 %v3453_v16, %v3453_v16 }
 0x8a0   :  { %v1587_v11 = vpop.f32.mrf.mxu1 }
 0x8a1   :  { %v1588_v53 = vadd.f32 %v1587_v11, %v1522_v23  ;;  %v1603_v17 = vmul.f32 %v3450_v13, %v3450_v13  ;;  %v3461_v14 = vadd.f32 %v1596_v15, %v3341_v4 }
 0x8a3   :  { %v3456_v30 = vadd.f32 %v1588_v53, %v3336_v12  ;;  %v1606_v2 = vmul.f32 %v3461_v14, %v3461_v14 }
 0x8a5   :  { %v1604_v28 = vmul.f32 %v3456_v30, %v3456_v30 }
 0x8a7   :  { %v1607_v18 = vadd.f32 %v1604_v28, %v1603_v17 }
 0x8a9   :  { %v1608_v26 = vadd.f32 %v1607_v18, %v1605_v63 }
 0x8ab   :  { %v1609_v20 = vadd.f32 %v1608_v26, %v1606_v2 }
 0x8ad   :  { %v1610_v12 = vrot.slane %v1609_v20, 4 }
 0x8af   :  { %v1611_v21 = vadd.f32 %v1610_v12, %v1609_v20 }
 0x8b1   :  { %v1612_v27 = vrot.slane %v1611_v21, 2 }
 0x8b3   :  { %v1613_v29 = vadd.f32 %v1612_v27, %v1611_v21 }
 0x8b5   :  { %v1614_v31 = vrot.slane %v1613_v29, 1 }
 0x8b7   :  { %v1615_v34 = vadd.f32 %v1614_v31, %v1613_v29 }
 0x8b9   :  { %v1616_v4 = vmul.f32 0.03125, %v1615_v34  ;;  %v2627_v34 = vld [vmem:[%s3584_s8 + $0x28] sm:$0xff]  }
 0x8bb   :  { %v1617_v35 = vadd.f32 1e-05, %v1616_v4  ;;  %v2628_v4 = vld [vmem:[%s3586_s10 + $0x40] sm:$0xff]  }
 0x8bd   :  { %2766 = vrsqrt.f32 %v1617_v35  ;;  %v1834_v35 = vpop.permute.xlu1 %1833 }
 0x8ca   :  { %v2767_v38 = vpop.eup %2766 }
 0x8cb   :  { %v1620_v41 = vmul.f32 %v2767_v38, %v3456_v30  ;;  %v1621_v42 = vmul.f32 %v2767_v38, %v3453_v16  ;;  %v1622_v24 = vmul.f32 %v2767_v38, %v3461_v14  ;;  %v1619_v47 = vmul.f32 %v2767_v38, %v3450_v13 }
 0x8cd   :  { %v1645_v54 = vmul.f32 %v1636_v33, %v1621_v42  ;;  %v1646_v55 = vmul.f32 %v1641_v37, %v1622_v24  ;;  %v1643_v57 = vmul.f32 %v1626_v52, %v1619_v47  ;;  %v1644_v19 = vmul.f32 %v1631_v48, %v1620_v41  ;;  %v1829_v37 = vpop.permute.xlu0 %1828  ;;  %v1824_v42 = vpop.permute.xlu1 %1823 }
 0x8cf   :  { %v1648_v22 = vpack.c.bf16 %v1646_v55, %v1645_v54  ;;  %v1647_v36 = vpack.c.bf16 %v1644_v19, %v1643_v57 }
 0x8d1   :  { %2541 = vmatprep.subr.bf16.mxu1 %v1648_v22  ;;  %v1819_v48 = vpop.permute.xlu0 %1818 }
 0x8d2   :  { %2542 = vmatpush3.bf16.msra.mxu1 %v1648_v22  ;;  %v2629_v22 = vld [vmem:[%s3586_s10 + $0x48] sm:$0xff]  }
 0x8d3   :  { %2543 = vmatprep.subr.bf16.mxu1 %v1647_v36 }
 0x8d5   :  { %v1916_v60 = vpop.permute.xlu0 %1915 }
 0x8d6   :  { %2544 = vmatpush3.bf16.msra.mxu1 %v1647_v36  ;;  %v2630_v36 = vld [vmem:[%s3586_s10 + $0x50] sm:$0xff]  }
 0x8d9   :  { %2546 = vmatmul.mubr.msk.bf16.vlgmr.msra.gmra.mxu1 %vm426_vm2, %v2623_v58  ;;  %v2631_v58 = vld [vmem:[%s3586_s10 + $0x58] sm:$0xff]  }
 0x8da   :  { %2549 = vmatprep.mubr.msk.bf16.mxu1 %vm426_vm2, %v2624_v59  ;;  %v2632_v59 = vld [vmem:[%s3588_s12 + $0x20] sm:$0xff]  }
 0x8e1   :  { %2550 = vmatmul.mubr.msk.bf16.gmra.mxu1 %vm426_vm2, %v2625_v32  ;;  %v1921_v32 = vpop.permute.xlu1 %1920 }
 0x8e2   :  { %2577 = vmatprep.mubr.msk.bf16.mxu1 %vm426_vm2, %v2632_v59 }
 0x999   :  { %v2547_v62 = vpop.f32.mrf.mxu1 }
 0x99a   :  { %v1764_v45 = vadd.f32 %v2547_v62, %v1662_v8 }
 0x99b   :  { %v1755_v1 = vpop.f32.mrf.mxu1 }
 0x99c   :  { %v1788_v3 = vsub.f32 0.0, %v1764_v45  ;;  %v1756_v39 = vadd.f32 %v1755_v1, %v1652_v0 }
 0x99d   :  { %v2548_v46 = vpop.f32.mrf.mxu1 }
 0x99e   :  { %v1794_v5 = vmul.f32 1.442695, %v1788_v3  ;;  %v1786_v49 = vsub.f32 0.0, %v1756_v39  ;;  %v1767_v9 = vadd.f32 %v2548_v46, %v1667_v61  ;;  %v1911_v61 = vpop.permute.xlu1 %1910 }
 0x99f   :  { %v1758_v43 = vpop.f32.mrf.mxu1 }
 0x9a0   :  { %2768 = vpow2.f32 %v1794_v5  ;;  %v1790_v44 = vmul.f32 1.442695, %v1786_v49  ;;  %v1789_v23 = vsub.f32 0.0, %v1767_v9  ;;  %v1759_v6 = vadd.f32 %v1758_v43, %v1657_v40 }
 0x9a2   :  { %2770 = vpow2.f32 %v1790_v44  ;;  %v1796_v51 = vmul.f32 1.442695, %v1789_v23  ;;  %v1787_v50 = vsub.f32 0.0, %v1759_v6  ;;  %v1931_v40 = vpop.permute.xlu1 %1930 }
 0x9a4   :  { %2772 = vpow2.f32 %v1796_v51  ;;  %v1792_v56 = vmul.f32 1.442695, %v1787_v50 }
 0x9a6   :  { %2774 = vpow2.f32 %v1792_v56 }
 0x9ad   :  { %v2769_v7 = vpop.eup %2768 }
 0x9ae   :  { %v1800_v25 = vadd.f32 1.0, %v2769_v7 }
 0x9af   :  { %v2771_v10 = vpop.eup %2770 }
 0x9b0   :  { %v1798_v11 = vadd.f32 1.0, %v2771_v10  ;;  %2776 = vrcp.f32 %v1800_v25 }
 0x9b1   :  { %v2773_v15 = vpop.eup %2772 }
 0x9b2   :  { %v1801_v53 = vadd.f32 1.0, %v2773_v15  ;;  %2778 = vrcp.f32 %v1798_v11 }
 0x9b3   :  { %v2775_v17 = vpop.eup %2774 }
 0x9b4   :  { %2780 = vrcp.f32 %v1801_v53  ;;  %v1799_v28 = vadd.f32 1.0, %v2775_v17  ;;  %v1941_v17 = vpop.permute.xlu1 %1940 }
 0x9b6   :  { %2782 = vrcp.f32 %v1799_v28 }
 0x9bd   :  { %v2777_v63 = vpop.eup %2776 }
 0x9be   :  { %v1812_v26 = vmul.f32 %v2777_v63, %v1764_v45  ;;  %v1906_v45 = vpop.permute.xlu0 %1905 }
 0x9bf   :  { %v2779_v18 = vpop.eup %2778 }
 0x9c0   :  { %v1810_v21 = vmul.f32 %v2779_v18, %v1756_v39 }
 0x9c1   :  { %v2781_v2 = vpop.eup %2780 }
 0x9c2   :  { %v1813_v20 = vmul.f32 %v2781_v2, %v1767_v9 }
 0x9c3   :  { %v2783_v12 = vpop.eup %2782 }
 0x9c4   :  { %v1811_v27 = vmul.f32 %v2783_v12, %v1759_v6  ;;  %v1815_v29 = vpack.c.bf16 %v1813_v20, %v1812_v26  ;;  %v1926_v6 = vpop.permute.xlu0 %1925 }
 0x9c6   :  { %2553 = vmatprep.subr.bf16.mxu0 %v1815_v29  ;;  %v1814_v31 = vpack.c.bf16 %v1811_v27, %v1810_v21 }
 0x9c7   :  { %2554 = vmatpush3.bf16.msra.mxu0 %v1815_v29 }
 0x9c8   :  { %2555 = vmatprep.subr.bf16.mxu0 %v1814_v31  ;;  %v1936_v63 = vpop.permute.xlu0 %1935 }
 0x9cb   :  { %2556 = vmatpush3.bf16.msra.mxu0 %v1814_v31 }
 0x9ce   :  { %2558 = vmatmul.mubr.msk.bf16.vlgmr.msra.gmra.mxu0 %vm426_vm2, %v2627_v34 }
 0x9cf   :  { %2565 = vmatprep.mubr.msk.bf16.mxu0 %vm426_vm2, %v2628_v4 }
 0xa8e   :  { %v2559_v33 = vpop.f32.mrf.mxu0 }
 0xa8f   :  { %v3497_v24 = vadd.f32 %v2559_v33, %v1829_v37  ;;  %v2551_v37 = vpop.f32.mrf.mxu1 }
 0xa90   :  { %v1886_v38 = vpop.f32.mrf.mxu0 }
 0xa91   :  { %v3501_v54 = vadd.f32 %v1886_v38, %v1819_v48 }
 0xa92   :  { %v2560_v41 = vpop.f32.mrf.mxu0 }
 0xa93   :  { %v3499_v47 = vadd.f32 %v2560_v41, %v1834_v35 }
 0xa94   :  { %v1889_v52 = vpop.f32.mrf.mxu0 }
 0xa95   :  { %v1902_v55 = vpack.c.bf16 %v3499_v47, %v3497_v24  ;;  %v3505_v57 = vadd.f32 %v1889_v52, %v1824_v42  ;;  %v1682_v52 = vpop.permute.xlu0 %1681 }
 0xa96   :  { %v3537_v59 = vadd.f32 %v2551_v37, %v1682_v52 }
 0xa97   :  { %v1901_v19 = vpack.c.bf16 %v3505_v57, %v3501_v54  ;;  %2561 = vmatprep.subr.bf16.mxu0 %v1902_v55 }
 0xa98   :  { %2562 = vmatpush3.bf16.msra.mxu0 %v1902_v55  ;;  %v1771_v55 = vpop.f32.mrf.mxu1 }
 0xa99   :  { %2563 = vmatprep.subr.bf16.mxu0 %v1901_v19 }
 0xa9c   :  { %2564 = vmatpush3.bf16.msra.mxu0 %v1901_v19 }
 0xa9f   :  { %2566 = vmatmul.mubr.msk.bf16.vlgmr.msra.gmra.mxu0 %vm426_vm2, %v2629_v22 }
 0xaa0   :  { %2569 = vmatprep.mubr.msk.bf16.mxu0 %vm426_vm2, %v2630_v36  ;;  %v1687_v36 = vpop.permute.xlu1 %1686 }
 0xaa7   :  { %2570 = vmatmul.mubr.msk.bf16.gmra.mxu0 %vm426_vm2, %v2631_v58  ;;  %v2552_v58 = vpop.f32.mrf.mxu1 }
 0xb5f   :  { %v2567_v8 = vpop.f32.mrf.mxu0 }
 0xb60   :  { %v3525_v62 = vadd.f32 %v2567_v8, %v1916_v60 }
 0xb61   :  { %v2009_v0 = vpop.f32.mrf.mxu0 }
 0xb62   :  { %v2046_v1 = vand.u32 2147483647, %v3525_v62  ;;  %v3528_v3 = vadd.f32 %v2009_v0, %v1906_v45  ;;  %v1774_v45 = vpop.f32.mrf.mxu1 }
 0xb63   :  { %v2568_v39 = vpop.f32.mrf.mxu0 }
 0xb64   :  { %v2050_v46 = vsub.f32 0.0, %v2046_v1  ;;  %v2044_v5 = vand.u32 2147483647, %v3528_v3  ;;  %v3531_v49 = vadd.f32 %v2568_v39, %v1921_v32  ;;  %v1672_v32 = vpop.permute.xlu0 %1671  ;;  %v2123_v1 = vsub.f32 0.0, %v3537_v59  ;;  %v1677_v39 = vpop.permute.xlu1 %1676 }
 0xb65   :  { %v2012_v9 = vpop.f32.mrf.mxu0  ;;  %v3539_v8 = vadd.f32 %v1771_v55, %v1672_v32 }
 0xb66   :  { %v2056_v43 = vmul.f32 1.442695, %v2050_v46  ;;  %v2048_v44 = vsub.f32 0.0, %v2044_v5  ;;  %v2047_v23 = vand.u32 2147483647, %v3531_v49  ;;  %v3534_v51 = vadd.f32 %v2012_v9, %v1911_v61 }
 0xb67   :  { %v2571_v50 = vpop.f32.mrf.mxu0  ;;  %v3541_v61 = vadd.f32 %v2552_v58, %v1687_v36  ;;  %v2042_v46 = vmax.f32 %v3525_v62, 0.0 }
 0xb68   :  { %2784 = vpow2.f32 %v2056_v43  ;;  %v2052_v56 = vmul.f32 1.442695, %v2048_v44  ;;  %v2051_v7 = vsub.f32 0.0, %v2047_v23  ;;  %v2045_v25 = vand.u32 2147483647, %v3534_v51 }
 0xb69   :  { %v2025_v10 = vpop.f32.mrf.mxu0  ;;  %v2034_v26 = vadd.f32 %v2571_v50, %v1936_v63  ;;  %v2121_v43 = vsub.f32 0.0, %v3539_v8  ;;  %v3546_v44 = vadd.f32 %v1774_v45, %v1677_v39  ;;  %v2124_v23 = vsub.f32 0.0, %v3541_v61 }
 0xb6a   :  { %2786 = vpow2.f32 %v2052_v56  ;;  %v2058_v11 = vmul.f32 1.442695, %v2051_v7  ;;  %v2049_v15 = vsub.f32 0.0, %v2045_v25  ;;  %v2026_v28 = vadd.f32 %v2025_v10, %v1926_v6 }
 0xb6b   :  { %v2572_v53 = vpop.f32.mrf.mxu0  ;;  %v2040_v50 = vmax.f32 %v3528_v3, 0.0  ;;  %v2129_v25 = vmul.f32 1.442695, %v2123_v1  ;;  %v2043_v10 = vmax.f32 %v3531_v49, 0.0  ;;  %v2041_v3 = vmax.f32 %v3534_v51, 0.0 }
 0xb6c   :  { %2788 = vpow2.f32 %v2058_v11  ;;  %v2054_v18 = vmul.f32 1.442695, %v2049_v15  ;;  %v2037_v20 = vadd.f32 %v2572_v53, %v1941_v17  ;;  %v2076_v21 = vmul.f32 %v2034_v26, %v2026_v28 }
 0xb6d   :  { %v2028_v2 = vpop.f32.mrf.mxu0  ;;  %v2125_v17 = vmul.f32 1.442695, %v2121_v43  ;;  %v2122_v28 = vsub.f32 0.0, %v3546_v44 }
 0xb6e   :  { %v2029_v12 = vadd.f32 %v2028_v2, %v1931_v40  ;;  %2790 = vpow2.f32 %v2054_v18  ;;  %v2131_v18 = vmul.f32 1.442695, %v2124_v23 }
 0xb70   :  { %v2077_v27 = vmul.f32 %v2037_v20, %v2029_v12 }
 0xb72   :  { %v2078_v29 = vadd.f32 %v2077_v27, %v2076_v21  ;;  %v2127_v27 = vmul.f32 1.442695, %v2122_v28 }
 0xb74   :  { %v2079_v4 = vrot.slane %v2078_v29, 4 }
 0xb75   :  { %v2785_v31 = vpop.eup %2784 }
 0xb76   :  { %v2062_v34 = vadd.f32 1.0, %v2785_v31  ;;  %v2080_v42 = vadd.f32 %v2079_v4, %v2078_v29 }
 0xb77   :  { %v2787_v35 = vpop.eup %2786 }
 0xb78   :  { %2792 = vlog2.f32 %v2062_v34  ;;  %v2060_v33 = vadd.f32 1.0, %v2787_v35  ;;  %v2081_v22 = vrot.slane %v2080_v42, 2 }
 0xb79   :  { %v2789_v38 = vpop.eup %2788 }
 0xb7a   :  { %2794 = vlog2.f32 %v2060_v33  ;;  %v2063_v41 = vadd.f32 1.0, %v2789_v38  ;;  %v2082_v60 = vadd.f32 %v2081_v22, %v2080_v42 }
 0xb7b   :  { %v2791_v48 = vpop.eup %2790 }
 0xb7c   :  { %2796 = vlog2.f32 %v2063_v41  ;;  %v2061_v19 = vadd.f32 1.0, %v2791_v48  ;;  %v2083_v9 = vrot.slane %v2082_v60, 1 }
 0xb7e   :  { %2798 = vlog2.f32 %v2061_v19  ;;  %v2084_v53 = vadd.f32 %v2083_v9, %v2082_v60 }
 0xb7f   :  { %2800 = vpow2.f32 %v2129_v25 }
 0xb80   :  { %2802 = vpow2.f32 %v2125_v17 }
 0xb81   :  { %2804 = vpow2.f32 %v2131_v18 }
 0xb85   :  { %v2793_v0 = vpop.eup %2792 }
 0xb86   :  { %v2069_v5 = vmul.f32 0.6931472, %v2793_v0 }
 0xb87   :  { %v2795_v40 = vpop.eup %2794 }
 0xb88   :  { %v2074_v6 = vadd.f32 %v2069_v5, %v2042_v46  ;;  %v2065_v56 = vmul.f32 0.6931472, %v2795_v40 }
 0xb89   :  { %v2797_v7 = vpop.eup %2796 }
 0xb8a   :  { %v2087_v11 = vmul.f32 %v2074_v6, %v3497_v24  ;;  %v2072_v62 = vadd.f32 %v2065_v56, %v2040_v50  ;;  %v2071_v15 = vmul.f32 0.6931472, %v2797_v7 }
 0xb8b   :  { %v2799_v63 = vpop.eup %2798 }
 0xb8c   :  { %v2085_v2 = vmul.f32 %v2072_v62, %v3501_v54  ;;  %v2075_v26 = vadd.f32 %v2071_v15, %v2043_v10  ;;  %v2091_v20 = vmul.f32 %v2087_v11, %v2084_v53  ;;  %v2067_v12 = vmul.f32 0.6931472, %v2799_v63  ;;  %v2801_v41 = vpop.eup %2800 }
 0xb8d   :  { %v2803_v42 = vpop.eup %2802  ;;  %v2135_v52 = vadd.f32 1.0, %v2801_v41 }
 0xb8e   :  { %v2088_v49 = vmul.f32 %v2075_v26, %v3499_v47  ;;  %v2095_v21 = vsub.f32 0.0, %v2091_v20  ;;  %v2089_v24 = vmul.f32 %v2085_v2, %v2084_v53  ;;  %v2073_v29 = vadd.f32 %v2067_v12, %v2041_v3  ;;  %v2805_v48 = vpop.eup %2804 }
 0xb8f   :  { %v2133_v19 = vadd.f32 1.0, %v2803_v42  ;;  %v2136_v36 = vadd.f32 1.0, %v2805_v48 }
 0xb90   :  { %v2092_v31 = vmul.f32 %v2088_v49, %v2084_v53  ;;  %v2101_v34 = vmul.f32 1.442695, %v2095_v21  ;;  %v2093_v4 = vsub.f32 0.0, %v2089_v24  ;;  %v2086_v35 = vmul.f32 %v2073_v29, %v3505_v57 }
 0xb92   :  { %v2096_v54 = vsub.f32 0.0, %v2092_v31  ;;  %2806 = vpow2.f32 %v2101_v34  ;;  %v2097_v37 = vmul.f32 1.442695, %v2093_v4  ;;  %v2090_v33 = vmul.f32 %v2086_v35, %v2084_v53 }
 0xb93   :  { %2808 = vpow2.f32 %v2127_v27 }
 0xb94   :  { %v2103_v51 = vmul.f32 1.442695, %v2096_v54  ;;  %2810 = vpow2.f32 %v2097_v37  ;;  %v2094_v38 = vsub.f32 0.0, %v2090_v33 }
 0xb96   :  { %2812 = vpow2.f32 %v2103_v51  ;;  %v2099_v47 = vmul.f32 1.442695, %v2094_v38  ;;  %v58_v38 = vld [vmem:[%s3579_s3] sm:$0x3] }
 0xb98   :  { %2814 = vpow2.f32 %v2099_v47 }
 0xb99   :  { %2816 = vrcp.f32 %v2135_v52 }
 0xb9f   :  { %v2807_v55 = vpop.eup %2806 }
 0xba0   :  { %v2809_v22 = vpop.eup %2808  ;;  %v2107_v57 = vadd.f32 1.0, %v2807_v55 }
 0xba1   :  { %v2811_v58 = vpop.eup %2810  ;;  %v2134_v45 = vadd.f32 1.0, %v2809_v22 }
 0xba2   :  { %2818 = vrcp.f32 %v2107_v57  ;;  %v2105_v32 = vadd.f32 1.0, %v2811_v58 }
 0xba3   :  { %v2813_v60 = vpop.eup %2812  ;;  %2820 = vrcp.f32 %v2133_v19 }
 0xba4   :  { %2822 = vrcp.f32 %v2136_v36  ;;  %v2108_v0 = vadd.f32 1.0, %v2813_v60 }
 0xba5   :  { %2824 = vrcp.f32 %v2105_v32  ;;  %v2815_v1 = vpop.eup %2814 }
 0xba6   :  { %2826 = vrcp.f32 %v2108_v0  ;;  %v2106_v39 = vadd.f32 1.0, %v2815_v1  ;;  %v2817_v46 = vpop.eup %2816 }
 0xba7   :  { %2828 = vrcp.f32 %v2134_v45  ;;  %v2147_v56 = vmul.f32 %v2817_v46, %v3537_v59  ;;  %v2633_v59 = vld [vmem:[%s3588_s12 + $0x28] sm:$0xff]  }
 0xba8   :  { %2830 = vrcp.f32 %v2106_v39 }
 0xbaf   :  { %v2819_v5 = vpop.eup %2818 }
 0xbb0   :  { %v2821_v9 = vpop.eup %2820  ;;  %v2119_v23 = vmul.f32 %v2819_v5, %v2091_v20 }
 0xbb1   :  { %v2823_v40 = vpop.eup %2822  ;;  %v2145_v53 = vmul.f32 %v2821_v9, %v3539_v8  ;;  %v2173_v8 = vpop.permute.xlu1 %2172 }
 0xbb2   :  { %v2825_v43 = vpop.eup %2824  ;;  %v2148_v7 = vmul.f32 %v2823_v40, %v3541_v61  ;;  %v2151_v62 = vmul.f32 %v2147_v56, %v2119_v23  ;;  %v2855_v61 = vmov 0.0  }
 0xbb3   :  { %v2827_v6 = vpop.eup %2826  ;;  %v2117_v10 = vmul.f32 %v2825_v43, %v2089_v24 }
 0xbb4   :  { %v2829_v50 = vpop.eup %2828  ;;  %v2120_v25 = vmul.f32 %v2827_v6, %v2092_v31 }
 0xbb5   :  { %v2831_v11 = vpop.eup %2830  ;;  %v2146_v17 = vmul.f32 %v2829_v50, %v3546_v44  ;;  %v2149_v18 = vmul.f32 %v2145_v53, %v2117_v10  ;;  %v2168_v44 = vpop.permute.xlu0 %2167 }
 0xbb6   :  { %v2152_v15 = vmul.f32 %v2148_v7, %v2120_v25  ;;  %v2118_v28 = vmul.f32 %v2831_v11, %v2090_v33  ;;  %v2163_v21 = vpop.permute.xlu1 %2162 }
 0xbb8   :  { %v2154_v63 = vpack.c.bf16 %v2152_v15, %v2151_v62  ;;  %v2150_v2 = vmul.f32 %v2146_v17, %v2118_v28 }
 0xbb9   :  { %v2158_v27 = vpop.permute.xlu0 %2157 }
 0xbba   :  { %2573 = vmatprep.subr.bf16.mxu1 %v2154_v63  ;;  %v2153_v26 = vpack.c.bf16 %v2150_v2, %v2149_v18 }
 0xbbb   :  { %2574 = vmatpush3.bf16.msra.mxu1 %v2154_v63 }
 0xbbc   :  { %2575 = vmatprep.subr.bf16.mxu1 %v2153_v26 }
 0xbbf   :  { %2576 = vmatpush3.bf16.msra.mxu1 %v2153_v26 }
 0xbc0   :  { %2581 = vmatprep.subr.bf16.mxu1 %v2855_v61 }
 0xbc2   :  { %2578 = vmatmul.mubr.msk.bf16.vlgmr.msra.gmra.mxu1 %vm426_vm2, %v2633_v59 }
 0xbc3   :  { %2585 = vmatprep.mubr.msk.bf16.mxu1 %vm2856_vm7, %v2855_v61 }
 0xc82   :  { %v2579_v20 = vpop.f32.mrf.mxu1 }
 0xc83   :  { %v2234_v12 = vadd.f32 %v2579_v20, %v2168_v44 }
 0xc84   :  { %v2225_v3 = vpop.f32.mrf.mxu1 }
 0xc85   :  { %v2242_v31 = vadd.f32 %v2234_v12, %v3453_v16  ;;  %v2226_v34 = vadd.f32 %v2225_v3, %v2158_v27  ;;  %v2249_v16 = vpop.permute.xlu0 %2248 }
 0xc86   :  { %v2580_v49 = vpop.f32.mrf.mxu1 }
 0xc87   :  { %v2237_v24 = vadd.f32 %v2580_v49, %v2173_v8  ;;  %v2240_v33 = vadd.f32 %v2226_v34, %v3450_v13 }
 0xc88   :  { %v2228_v29 = vpop.f32.mrf.mxu1 }
 0xc89   :  { %v2243_v4 = vadd.f32 %v2237_v24, %v3461_v14  ;;  %v2229_v35 = vadd.f32 %v2228_v29, %v2163_v21 }
 0xc8b   :  { %v2245_v54 = vpack.c.bf16 %v2243_v4, %v2242_v31  ;;  %v2241_v37 = vadd.f32 %v2229_v35, %v3456_v30 }
 0xc8d   :  { %2582 = vmatpush3.bf16.msra.mxu1 %v2245_v54  ;;  %v2244_v51 = vpack.c.bf16 %v2241_v37, %v2240_v33 }
 0xc8e   :  { %2583 = vmatprep.subr.bf16.mxu1 %v2855_v61 }
 0xc91   :  { %2584 = vmatpush3.bf16.msra.mxu1 %v2244_v51 }
 0xc94   :  { %2586 = vmatmul.mubr.msk.bf16.vlgmr.msra.gmra.mxu1 %vm426_vm2, %v58_v38 }
 0xd54   :  { %v2288_v47 = vpop.f32.mrf.mxu1 }
 0xd55   :  { %v2289_v41 = vadd.f32 %v2288_v47, %v2249_v16 }
 0xd56   :  { %v2587_v14 = vpop.f32.mrf.mxu1 }
 0xd57   :  { %v2295_v42 = vmul.f32 0.01, %v2289_v41  ;;  %vm2294_vm8 = vcmp.ge.f32.partialorder %v2289_v41, 0.0 }
 0xd58   :  { %v2291_v30 = vpop.f32.mrf.mxu1 }
 0xd59   :  { %v2296_v13 = vsel %vm2294_vm8, %v2289_v41, %v2295_v42 }
 0xd5a   :  { %v2588_v48 = vpop.f32.mrf.mxu1  ;;  %2297 = vst [vmem:[#allocation2] sm:$0xf] %v2296_v13 }
 0xd5b   :  { %2843 = shalt.err (!%p2840_p4)
}
 0xd5c   :  { %2307 = dma.vmem_to_hbm [thread:$0]  %s2305_s18, 64, %s3590_s14, [#allocation3]  }
 0xd5d   :  { %2852 = dma.done.wait [#allocation3], 64  }
 0xd5e   :  { %2853 = vsyncadd [#allocation3], 4294967232 }
 0xd5f   :  { %2311 = vsyncpa [#allocation3], 1 }

</bundles_post_ra>
